<compile_context>
chip_gen: v7x
topology: tpu7x:2x2x1
jax: 0.10.0
libtpu: 0.0.40
codegen_flags: <defaults>
</compile_context>

<pallas_src>
import functools

import jax
import jax.numpy as jnp
from jax import lax
from jax.experimental import pallas as pl
from jax.experimental.pallas import tpu as pltpu

LANE = 128


def _round_up(x, m):
    return (x + m - 1) // m * m


# ----------------------------------------------------------------------------
# Fused DoubleConv kernel: one image per grid step.
#   conv1: single im2col matmul  (H*W, K1p) @ (K1p, CMp)           [bf16 x bf16 -> f32]
#   conv2: three matmuls (one per ky): (H*W, 3*CMp) @ (3*CMp, COp)  [bf16 x bf16 -> f32]
# ----------------------------------------------------------------------------
def _double_conv_kernel(xcol_ref, w1_ref, b1_ref, w2_ref, b2_ref, o_ref, hx_ref, *, H, W):
    # xcol_ref: (1, H*W, K1p)    bf16   im2col of the input (K = 9*C_in, zero padded)
    # w1_ref  : (K1p, CMp)       bf16   conv1 weights with BN1 folded in
    # b1_ref  : (1, CMp)         f32    conv1 + BN1 folded bias
    # w2_ref  : (3, 3*CMp, COp)  bf16   conv2 weights with BN2 folded; [ky, kx*CMp + cin, cout]
    # b2_ref  : (1, COp)         f32
    # o_ref   : (1, H*W, COp)    f32
    # hx_ref  : (H+2, W, 3*CMp)  bf16 scratch: the 3 kx-shifted, zero-padded copies of the
    #           intermediate activation packed along lanes (block kx at lanes [kx*CMp, ...)).
    CMp = w1_ref.shape[1]
    COp = w2_ref.shape[2]

    # ---- conv1 (3x3, pad=1) + folded BN1 + ReLU: ONE MXU matmul ----------------------------
    acc1 = jnp.dot(xcol_ref[0], w1_ref[...], preferred_element_type=jnp.float32)
    h1 = jnp.maximum(acc1 + b1_ref[...], 0.0).astype(jnp.bfloat16).reshape(H, W, CMp)

    # ---- stage the intermediate: zero ONLY the halo ring, then write the interior ----------
    # (scratch persists across grid steps / cores, so the ring is re-zeroed every step.)
    zrow = jnp.zeros((1, W, 3 * CMp), hx_ref.dtype)
    zcol = jnp.zeros((H, 1, 3 * CMp), hx_ref.dtype)
    hx_ref[0:1] = zrow
    hx_ref[H + 1:H + 2] = zrow
    hx_ref[1:H + 1, 0:1, :] = zcol
    hx_ref[1:H + 1, W - 1:W, :] = zcol
    # kx = 0 tap: h_pad[:, 0:W]   -> left-shifted h1 (column 0 stays zero)
    hx_ref[1:H + 1, 1:W, 0:CMp] = h1[:, :W - 1, :]
    # kx = 1 tap: h_pad[:, 1:W+1] -> h1 itself
    hx_ref[1:H + 1, 0:W, CMp:2 * CMp] = h1
    # kx = 2 tap: h_pad[:, 2:W+2] -> right-shifted h1 (column W-1 stays zero)
    hx_ref[1:H + 1, 0:W - 1, 2 * CMp:3 * CMp] = h1[:, 1:, :]

    # ---- conv2 (3x3, pad=1) + folded BN2 + ReLU: 3 matmuls, K = 3*CMp -----------------------
    acc2 = jnp.zeros((H * W, COp), jnp.float32)
    for ky in range(3):  # ky slices are free leading-dim slices of the packed scratch
        lhs = hx_ref[ky:ky + H].reshape(H * W, 3 * CMp)
        acc2 += jnp.dot(lhs, w2_ref[ky], preferred_element_type=jnp.float32)
    o_ref[0] = jnp.maximum(acc2 + b2_ref[...], 0.0).astype(o_ref.dtype)


# ----------------------------------------------------------------------------
# Host-side prep: BN folding, bf16 weight packing, im2col (pure layout plumbing)
# ----------------------------------------------------------------------------
def _fold_bn(w_oihw, b, gamma, beta, mean, var, eps):
    s = gamma / jnp.sqrt(var + eps)                          # (C_out,)
    return w_oihw * s[:, None, None, None], (b - mean) * s + beta


def _pack_conv1_weights(w_oihw, k1_p, cm_p):
    # (CM, CI, 3, 3) -> (k1_p, cm_p); row index = (ky*3 + kx)*CI + cin (matches im2col columns)
    co, ci = w_oihw.shape[0], w_oihw.shape[1]
    w = jnp.transpose(w_oihw, (2, 3, 1, 0)).reshape(9 * ci, co)
    return jnp.pad(w, ((0, k1_p - 9 * ci), (0, cm_p - co)))


def _pack_conv2_weights(w_oihw, cm_p, co_p):
    # (CO, CM, 3, 3) -> (3, 3*cm_p, co_p) with index [ky, kx*cm_p + cin, cout]
    co, cm = w_oihw.shape[0], w_oihw.shape[1]
    w = jnp.transpose(w_oihw, (2, 3, 1, 0))                  # (3, 3, CM, CO)
    w = jnp.pad(w, ((0, 0), (0, 0), (0, cm_p - cm), (0, co_p - co)))
    return w.reshape(3, 3 * cm_p, co_p)


def _im2col_3x3(x_nhwc):
    # (N, H, W, CI) -> (N, H*W, 9*CI) with column index (ky*3 + kx)*CI + cin
    n, h, w, ci = x_nhwc.shape
    xp = jnp.pad(x_nhwc, ((0, 0), (1, 1), (1, 1), (0, 0)))
    cols = [xp[:, ky:ky + h, kx:kx + w, :] for ky in range(3) for kx in range(3)]
    return jnp.concatenate(cols, axis=-1).reshape(n, h * w, 9 * ci)


def double_conv_forward(x_nchw, params, eps=1e-5):
    """x_nchw: (N, C_in, H, W) float32 -> (N, C_out, H, W) float32 (eval-mode BatchNorm)."""
    n, ci, hgt, wid = x_nchw.shape
    cm = params["w1"].shape[0]
    co = params["w2"].shape[0]
    hw = hgt * wid
    k1_p = _round_up(9 * ci, LANE)
    cm_p = _round_up(cm, LANE)
    co_p = _round_up(co, LANE)

    # Fold inference BatchNorm into the conv weights/bias; matmul operands go to bf16.
    w1f, b1f = _fold_bn(params["w1"], params["b1"], params["g1"], params["be1"],
                        params["m1"], params["v1"], eps)
    w2f, b2f = _fold_bn(params["w2"], params["b2"], params["g2"], params["be2"],
                        params["m2"], params["v2"], eps)
    w1c = _pack_conv1_weights(w1f, k1_p, cm_p).astype(jnp.bfloat16)
    w2c = _pack_conv2_weights(w2f, cm_p, co_p).astype(jnp.bfloat16)
    b1r = jnp.pad(b1f, (0, cm_p - cm)).reshape(1, cm_p).astype(jnp.float32)
    b2r = jnp.pad(b2f, (0, co_p - co)).reshape(1, co_p).astype(jnp.float32)

    # Host-side im2col: conv1 becomes a single K = 9*C_in matmul inside the kernel.
    x_col = _im2col_3x3(jnp.transpose(x_nchw, (0, 2, 3, 1)))
    x_col = jnp.pad(x_col, ((0, 0), (0, 0), (0, k1_p - 9 * ci))).astype(jnp.bfloat16)

    kernel = functools.partial(_double_conv_kernel, H=hgt, W=wid)

    # Cost estimate with REAL channel counts (not padded ones).
    flops = 2 * n * 9 * hw * (ci * cm + cm * co)
    bytes_accessed = int(x_col.size * 2 + w1c.size * 2 + w2c.size * 2
                         + (b1r.size + b2r.size) * 4 + n * hw * co_p * 4)

    # Explicit VMEM budget: double-buffered blocks + weights + scratch + live accumulators.
    block_bytes = (2 * hw * k1_p * 2 + 2 * hw * co_p * 4
                   + 2 * (w1c.size + w2c.size) * 2 + 2 * (b1r.size + b2r.size) * 4
                   + (hgt + 2) * wid * 3 * cm_p * 2
                   + hw * (cm_p + co_p) * 4 + hw * 3 * cm_p * 2)
    vmem_limit = int(min(100 * 1024 * 1024, max(32 * 1024 * 1024, 2 * block_bytes)))

    out = pl.pallas_call(
        kernel,
        out_shape=jax.ShapeDtypeStruct((n, hw, co_p), jnp.float32),
        grid_spec=pltpu.PrefetchScalarGridSpec(
            num_scalar_prefetch=0,
            grid=(n,),
            in_specs=[
                pl.BlockSpec((1, hw, k1_p), lambda i: (i, 0, 0)),
                pl.BlockSpec((k1_p, cm_p), lambda i: (0, 0)),
                pl.BlockSpec((1, cm_p), lambda i: (0, 0)),
                pl.BlockSpec((3, 3 * cm_p, co_p), lambda i: (0, 0, 0)),
                pl.BlockSpec((1, co_p), lambda i: (0, 0)),
            ],
            out_specs=pl.BlockSpec((1, hw, co_p), lambda i: (i, 0, 0)),
            scratch_shapes=[pltpu.VMEM((hgt + 2, wid, 3 * cm_p), jnp.bfloat16)],
        ),
        compiler_params=pltpu.CompilerParams(
            dimension_semantics=("parallel",),
            vmem_limit_bytes=vmem_limit),
        cost_estimate=pl.CostEstimate(flops=flops, transcendentals=0,
                                      bytes_accessed=bytes_accessed),
    )(x_col, w1c, b1r, w2c, b2r)

    # Strip channel padding, back to NCHW.  (In a full model keep padded NHWC between layers.)
    out = out[..., :co].reshape(n, hgt, wid, co)
    return jnp.transpose(out, (0, 3, 1, 2))


# ----------------------------------------------------------------------------
# References
# ----------------------------------------------------------------------------
def reference_forward(x, params, eps=1e-5):
    """Pure float32 module semantics: conv3x3 -> BN(running stats) -> ReLU, twice."""
    def block(x, w, b, g, be, m, v):
        y = lax.conv_general_dilated(
            x, w, window_strides=(1, 1), padding=((1, 1), (1, 1)),
            dimension_numbers=("NCHW", "OIHW", "NCHW"),
            precision=lax.Precision.HIGHEST)
        y = (y + b[None, :, None, None] - m[None, :, None, None]) \
            / jnp.sqrt(v[None, :, None, None] + eps)
        return jnp.maximum(y * g[None, :, None, None] + be[None, :, None, None], 0.0)

    h = block(x, params["w1"], params["b1"], params["g1"], params["be1"],
              params["m1"], params["v1"])
    return block(h, params["w2"], params["b2"], params["g2"], params["be2"],
                 params["m2"], params["v2"])


def reference_forward_bf16_operands(x, params, eps=1e-5):
    """Same numerics as the kernel (BN folded, bf16 matmul operands, f32 accumulation) but
    computed with XLA convolutions — an independent path for a tight correctness check."""
    def q(a):
        return a.astype(jnp.bfloat16).astype(jnp.float32)

    def block(x, w, b, g, be, m, v):
        wf, bf = _fold_bn(w, b, g, be, m, v, eps)
        y = lax.conv_general_dilated(
            q(x), q(wf), window_strides=(1, 1), padding=((1, 1), (1, 1)),
            dimension_numbers=("NCHW", "OIHW", "NCHW"),
            precision=lax.Precision.HIGHEST)
        return jnp.maximum(y + bf[None, :, None, None], 0.0)

    h = block(x, params["w1"], params["b1"], params["g1"], params["be1"],
              params["m1"], params["v1"])
    return block(h, params["w2"], params["b2"], params["g2"], params["be2"],
                 params["m2"], params["v2"])


# ----------------------------------------------------------------------------
# Main
# ----------------------------------------------------------------------------
if __name__ == "__main__":
    N, C_IN, C_MID, C_OUT, H, W = 2, 4, 32, 32, 16, 16

    key = jax.random.PRNGKey(0)
    ks = jax.random.split(key, 13)
    params = {
        "w1": jax.random.normal(ks[0], (C_MID, C_IN, 3, 3), jnp.float32) * 0.1,
        "b1": jax.random.normal(ks[1], (C_MID,), jnp.float32) * 0.1,
        "g1": 0.5 + jax.random.uniform(ks[2], (C_MID,), jnp.float32),
        "be1": jax.random.normal(ks[3], (C_MID,), jnp.float32) * 0.1,
        "m1": jax.random.normal(ks[4], (C_MID,), jnp.float32) * 0.1,
        "v1": 0.5 + jax.random.uniform(ks[5], (C_MID,), jnp.float32),
        "w2": jax.random.normal(ks[6], (C_OUT, C_MID, 3, 3), jnp.float32) * 0.1,
        "b2": jax.random.normal(ks[7], (C_OUT,), jnp.float32) * 0.1,
        "g2": 0.5 + jax.random.uniform(ks[8], (C_OUT,), jnp.float32),
        "be2": jax.random.normal(ks[9], (C_OUT,), jnp.float32) * 0.1,
        "m2": jax.random.normal(ks[10], (C_OUT,), jnp.float32) * 0.1,
        "v2": 0.5 + jax.random.uniform(ks[11], (C_OUT,), jnp.float32),
    }
    x = jax.random.normal(ks[12], (N, C_IN, H, W), jnp.float32)

    out = jax.jit(double_conv_forward)(x, params)
    out = jax.block_until_ready(out)
    assert out.shape == (N, C_OUT, H, W), out.shape

    # Tight check: independent XLA-conv path with identical numerics (folded BN, bf16 matmul
    # operands, f32 accumulation) -- catches any im2col / tap-packing / indexing bug.
    ref_q = reference_forward_bf16_operands(x, params)
    err_q = float(jnp.max(jnp.abs(out - ref_q)))
    assert jnp.allclose(out, ref_q, atol=1e-2, rtol=1e-2), err_q

    # Sanity check against the pure-f32 module semantics; bf16 matmul operands introduce
    # ~1e-2-level deviations at these channel counts.
    ref = reference_forward(x, params)
    err = float(jnp.max(jnp.abs(out - ref)))
    assert jnp.allclose(out, ref, atol=1e-1, rtol=1e-1), err

    print("KERNEL_OK")
</pallas_src>

<mosaic_0001>
module attributes {stable_mosaic.version = 11 : i64} {
  func.func @_double_conv_kernel(%arg0: i32, %arg1: memref<1x256x128xbf16, #tpu.memory_space<vmem>>, %arg2: memref<128x128xbf16, #tpu.memory_space<vmem>>, %arg3: memref<1x128xf32, #tpu.memory_space<vmem>>, %arg4: memref<3x384x128xbf16, #tpu.memory_space<vmem>>, %arg5: memref<1x128xf32, #tpu.memory_space<vmem>>, %arg6: memref<1x256x128xf32, #tpu.memory_space<vmem>>, %arg7: memref<18x16x384xbf16, #tpu.memory_space<vmem>>) attributes {dimension_semantics = [#tpu.dimension_semantics<parallel>], iteration_bounds = array<i64: 2>, scalar_prefetch = 0 : i64, scratch_operands = 1 : i64, tpu.core_type = #tpu.core_type<tc>, window_params = [{transform_indices = @transform_0, window_bounds = array<i64: 1, 256, 128>}, {pipeline_mode = #tpu.pipeline_mode<synchronous>, transform_indices = @transform_1, window_bounds = array<i64: 128, 128>}, {pipeline_mode = #tpu.pipeline_mode<synchronous>, transform_indices = @transform_2, window_bounds = array<i64: 1, 128>}, {pipeline_mode = #tpu.pipeline_mode<synchronous>, transform_indices = @transform_3, window_bounds = array<i64: 3, 384, 128>}, {pipeline_mode = #tpu.pipeline_mode<synchronous>, transform_indices = @transform_4, window_bounds = array<i64: 1, 128>}, {transform_indices = @transform_5, window_bounds = array<i64: 1, 256, 128>}]} {
    %c0 = arith.constant 0 : index
    %c0_0 = arith.constant 0 : index
    %c0_1 = arith.constant 0 : index
    %0 = vector.load %arg1[%c0, %c0_0, %c0_1] : memref<1x256x128xbf16, #tpu.memory_space<vmem>>, vector<1x256x128xbf16>
    %1 = vector.shape_cast %0 : vector<1x256x128xbf16> to vector<256x128xbf16>
    %c0_2 = arith.constant 0 : index
    %c0_3 = arith.constant 0 : index
    %2 = vector.load %arg2[%c0_2, %c0_3] : memref<128x128xbf16, #tpu.memory_space<vmem>>, vector<128x128xbf16>
    %cst = arith.constant dense<0.000000e+00> : vector<256x128xf32>
    %3 = tpu.matmul %1, %2, %cst {dimension_numbers = #tpu.dot_dimension_numbers<[1], [0], [0], [1], [0, 0, 1, 1], [], []>} : vector<256x128xbf16>, vector<128x128xbf16>, vector<256x128xf32> -> vector<256x128xf32>
    %c0_4 = arith.constant 0 : index
    %c0_5 = arith.constant 0 : index
    %4 = vector.load %arg3[%c0_4, %c0_5] : memref<1x128xf32, #tpu.memory_space<vmem>>, vector<1x128xf32>
    %5 = vector.broadcast %4 : vector<1x128xf32> to vector<256x128xf32>
    %6 = arith.addf %3, %5 : vector<256x128xf32>
    %cst_6 = arith.constant 0.000000e+00 : f32
    %7 = vector.broadcast %cst_6 : f32 to vector<256x128xf32>
    %8 = arith.maximumf %6, %7 : vector<256x128xf32>
    %9 = arith.truncf %8 : vector<256x128xf32> to vector<256x128xbf16>
    %10 = vector.shape_cast %9 : vector<256x128xbf16> to vector<16x16x128xbf16>
    %cst_7 = arith.constant 0.000000e+00 : bf16
    %11 = vector.broadcast %cst_7 : bf16 to vector<1x16x384xbf16>
    %cst_8 = arith.constant 0.000000e+00 : bf16
    %12 = vector.broadcast %cst_8 : bf16 to vector<16x1x384xbf16>
    %c0_9 = arith.constant 0 : index
    %c0_10 = arith.constant 0 : index
    %c0_11 = arith.constant 0 : index
    %13 = vector.load %arg7[%c0_9, %c0_10, %c0_11] : memref<18x16x384xbf16, #tpu.memory_space<vmem>>, vector<1x16x384xbf16>
    tpu.vector_store %arg7[%c0_9, %c0_10, %c0_11], %11 {strides = array<i32>} : memref<18x16x384xbf16, #tpu.memory_space<vmem>>, vector<1x16x384xbf16>,
    %c17 = arith.constant 17 : index
    %c0_12 = arith.constant 0 : index
    %c0_13 = arith.constant 0 : index
    %14 = vector.load %arg7[%c17, %c0_12, %c0_13] : memref<18x16x384xbf16, #tpu.memory_space<vmem>>, vector<1x16x384xbf16>
    tpu.vector_store %arg7[%c17, %c0_12, %c0_13], %11 {strides = array<i32>} : memref<18x16x384xbf16, #tpu.memory_space<vmem>>, vector<1x16x384xbf16>,
    %c1 = arith.constant 1 : index
    %c0_14 = arith.constant 0 : index
    %c0_15 = arith.constant 0 : index
    %15 = vector.load %arg7[%c1, %c0_14, %c0_15] : memref<18x16x384xbf16, #tpu.memory_space<vmem>>, vector<16x1x384xbf16>
    tpu.vector_store %arg7[%c1, %c0_14, %c0_15], %12 {strides = array<i32>} : memref<18x16x384xbf16, #tpu.memory_space<vmem>>, vector<16x1x384xbf16>,
    %c1_16 = arith.constant 1 : index
    %c15 = arith.constant 15 : index
    %c0_17 = arith.constant 0 : index
    %16 = vector.load %arg7[%c1_16, %c15, %c0_17] : memref<18x16x384xbf16, #tpu.memory_space<vmem>>, vector<16x1x384xbf16>
    tpu.vector_store %arg7[%c1_16, %c15, %c0_17], %12 {strides = array<i32>} : memref<18x16x384xbf16, #tpu.memory_space<vmem>>, vector<16x1x384xbf16>,
    %17 = vector.extract_strided_slice %10 {offsets = [0, 0, 0], sizes = [16, 15, 128], strides = [1, 1, 1]} : vector<16x16x128xbf16> to vector<16x15x128xbf16>
    %c1_18 = arith.constant 1 : index
    %c1_19 = arith.constant 1 : index
    %c0_20 = arith.constant 0 : index
    %18 = vector.load %arg7[%c1_18, %c1_19, %c0_20] : memref<18x16x384xbf16, #tpu.memory_space<vmem>>, vector<16x15x128xbf16>
    tpu.vector_store %arg7[%c1_18, %c1_19, %c0_20], %17 {strides = array<i32>} : memref<18x16x384xbf16, #tpu.memory_space<vmem>>, vector<16x15x128xbf16>,
    %c1_21 = arith.constant 1 : index
    %c0_22 = arith.constant 0 : index
    %c128 = arith.constant 128 : index
    %19 = vector.load %arg7[%c1_21, %c0_22, %c128] : memref<18x16x384xbf16, #tpu.memory_space<vmem>>, vector<16x16x128xbf16>
    tpu.vector_store %arg7[%c1_21, %c0_22, %c128], %10 {strides = array<i32>} : memref<18x16x384xbf16, #tpu.memory_space<vmem>>, vector<16x16x128xbf16>,
    %20 = vector.extract_strided_slice %10 {offsets = [0, 1, 0], sizes = [16, 15, 128], strides = [1, 1, 1]} : vector<16x16x128xbf16> to vector<16x15x128xbf16>
    %c1_23 = arith.constant 1 : index
    %c0_24 = arith.constant 0 : index
    %c256 = arith.constant 256 : index
    %21 = vector.load %arg7[%c1_23, %c0_24, %c256] : memref<18x16x384xbf16, #tpu.memory_space<vmem>>, vector<16x15x128xbf16>
    tpu.vector_store %arg7[%c1_23, %c0_24, %c256], %20 {strides = array<i32>} : memref<18x16x384xbf16, #tpu.memory_space<vmem>>, vector<16x15x128xbf16>,
    %cst_25 = arith.constant 0.000000e+00 : f32
    %22 = vector.broadcast %cst_25 : f32 to vector<256x128xf32>
    %c0_26 = arith.constant 0 : index
    %c0_27 = arith.constant 0 : index
    %c0_28 = arith.constant 0 : index
    %23 = vector.load %arg7[%c0_26, %c0_27, %c0_28] : memref<18x16x384xbf16, #tpu.memory_space<vmem>>, vector<16x16x384xbf16>
    %24 = vector.shape_cast %23 : vector<16x16x384xbf16> to vector<256x384xbf16>
    %c0_29 = arith.constant 0 : index
    %c0_30 = arith.constant 0 : index
    %c0_31 = arith.constant 0 : index
    %25 = vector.load %arg4[%c0_29, %c0_30, %c0_31] : memref<3x384x128xbf16, #tpu.memory_space<vmem>>, vector<1x384x128xbf16>
    %26 = vector.shape_cast %25 : vector<1x384x128xbf16> to vector<384x128xbf16>
    %cst_32 = arith.constant dense<0.000000e+00> : vector<256x128xf32>
    %27 = tpu.matmul %24, %26, %cst_32 {dimension_numbers = #tpu.dot_dimension_numbers<[1], [0], [0], [1], [0, 0, 1, 1], [], []>} : vector<256x384xbf16>, vector<384x128xbf16>, vector<256x128xf32> -> vector<256x128xf32>
    %28 = arith.addf %22, %27 : vector<256x128xf32>
    %c1_33 = arith.constant 1 : index
    %c0_34 = arith.constant 0 : index
    %c0_35 = arith.constant 0 : index
    %29 = vector.load %arg7[%c1_33, %c0_34, %c0_35] : memref<18x16x384xbf16, #tpu.memory_space<vmem>>, vector<16x16x384xbf16>
    %30 = vector.shape_cast %29 : vector<16x16x384xbf16> to vector<256x384xbf16>
    %c1_36 = arith.constant 1 : index
    %c0_37 = arith.constant 0 : index
    %c0_38 = arith.constant 0 : index
    %31 = vector.load %arg4[%c1_36, %c0_37, %c0_38] : memref<3x384x128xbf16, #tpu.memory_space<vmem>>, vector<1x384x128xbf16>
    %32 = vector.shape_cast %31 : vector<1x384x128xbf16> to vector<384x128xbf16>
    %cst_39 = arith.constant dense<0.000000e+00> : vector<256x128xf32>
    %33 = tpu.matmul %30, %32, %cst_39 {dimension_numbers = #tpu.dot_dimension_numbers<[1], [0], [0], [1], [0, 0, 1, 1], [], []>} : vector<256x384xbf16>, vector<384x128xbf16>, vector<256x128xf32> -> vector<256x128xf32>
    %34 = arith.addf %28, %33 : vector<256x128xf32>
    %c2 = arith.constant 2 : index
    %c0_40 = arith.constant 0 : index
    %c0_41 = arith.constant 0 : index
    %35 = vector.load %arg7[%c2, %c0_40, %c0_41] : memref<18x16x384xbf16, #tpu.memory_space<vmem>>, vector<16x16x384xbf16>
    %36 = vector.shape_cast %35 : vector<16x16x384xbf16> to vector<256x384xbf16>
    %c2_42 = arith.constant 2 : index
    %c0_43 = arith.constant 0 : index
    %c0_44 = arith.constant 0 : index
    %37 = vector.load %arg4[%c2_42, %c0_43, %c0_44] : memref<3x384x128xbf16, #tpu.memory_space<vmem>>, vector<1x384x128xbf16>
    %38 = vector.shape_cast %37 : vector<1x384x128xbf16> to vector<384x128xbf16>
    %cst_45 = arith.constant dense<0.000000e+00> : vector<256x128xf32>
    %39 = tpu.matmul %36, %38, %cst_45 {dimension_numbers = #tpu.dot_dimension_numbers<[1], [0], [0], [1], [0, 0, 1, 1], [], []>} : vector<256x384xbf16>, vector<384x128xbf16>, vector<256x128xf32> -> vector<256x128xf32>
    %40 = arith.addf %34, %39 : vector<256x128xf32>
    %c0_46 = arith.constant 0 : index
    %c0_47 = arith.constant 0 : index
    %41 = vector.load %arg5[%c0_46, %c0_47] : memref<1x128xf32, #tpu.memory_space<vmem>>, vector<1x128xf32>
    %42 = vector.broadcast %41 : vector<1x128xf32> to vector<256x128xf32>
    %43 = arith.addf %40, %42 : vector<256x128xf32>
    %cst_48 = arith.constant 0.000000e+00 : f32
    %44 = vector.broadcast %cst_48 : f32 to vector<256x128xf32>
    %45 = arith.maximumf %43, %44 : vector<256x128xf32>
    %c0_49 = arith.constant 0 : index
    %c0_50 = arith.constant 0 : index
    %c0_51 = arith.constant 0 : index
    %46 = vector.load %arg6[%c0_49, %c0_50, %c0_51] : memref<1x256x128xf32, #tpu.memory_space<vmem>>, vector<1x256x128xf32>
    %47 = vector.shape_cast %46 : vector<1x256x128xf32> to vector<256x128xf32>
    %48 = vector.shape_cast %45 : vector<256x128xf32> to vector<1x256x128xf32>
    tpu.vector_store %arg6[%c0_49, %c0_50, %c0_51], %48 {strides = array<i32>} : memref<1x256x128xf32, #tpu.memory_space<vmem>>, vector<1x256x128xf32>,
    return
  }
  func.func @transform_0(%arg0: i32) -> (i32, i32, i32) {
    %c0_i32 = arith.constant 0 : i32
    %c0_i32_0 = arith.constant 0 : i32
    %c0_i32_1 = arith.constant 0 : i32
    return %arg0, %c0_i32, %c0_i32_0 : i32, i32, i32
  }
  func.func @transform_1(%arg0: i32) -> (i32, i32) {
    %c0_i32 = arith.constant 0 : i32
    %c0_i32_0 = arith.constant 0 : i32
    %c0_i32_1 = arith.constant 0 : i32
    return %c0_i32, %c0_i32_0 : i32, i32
  }
  func.func @transform_2(%arg0: i32) -> (i32, i32) {
    %c0_i32 = arith.constant 0 : i32
    %c0_i32_0 = arith.constant 0 : i32
    %c0_i32_1 = arith.constant 0 : i32
    return %c0_i32, %c0_i32_0 : i32, i32
  }
  func.func @transform_3(%arg0: i32) -> (i32, i32, i32) {
    %c0_i32 = arith.constant 0 : i32
    %c0_i32_0 = arith.constant 0 : i32
    %c0_i32_1 = arith.constant 0 : i32
    %c0_i32_2 = arith.constant 0 : i32
    return %c0_i32, %c0_i32_0, %c0_i32_1 : i32, i32, i32
  }
  func.func @transform_4(%arg0: i32) -> (i32, i32) {
    %c0_i32 = arith.constant 0 : i32
    %c0_i32_0 = arith.constant 0 : i32
    %c0_i32_1 = arith.constant 0 : i32
    return %c0_i32, %c0_i32_0 : i32, i32
  }
  func.func @transform_5(%arg0: i32) -> (i32, i32, i32) {
    %c0_i32 = arith.constant 0 : i32
    %c0_i32_0 = arith.constant 0 : i32
    %c0_i32_1 = arith.constant 0 : i32
    return %arg0, %c0_i32, %c0_i32_0 : i32, i32, i32
  }
}

</mosaic_0001>

<bundles_post_ra>
// kernel: double_conv_forward.1
= control target key start
LH: loop header
LB: loop body
LE: loop exit
PB: predicated region body
PF: predicated region fallthrough
CT: control target
= control target key end

     0   :  { %10 = vsyncpa [#allocation4], 0  ;;  %s5642_s0 = inlined_call_operand.vmem [shape: bf16[2,256,128], index: 0, kind: input, shape index: {}]   ;;  %s5643_s1 = inlined_call_operand.vmem [shape: bf16[128,128], index: 1, kind: input, shape index: {}]   ;;  %s5644_s2 = inlined_call_operand.vmem [shape: f32[1,128], index: 2, kind: input, shape index: {}]   ;;  %s5645_s3 = inlined_call_operand.vmem [shape: bf16[3,384,128], index: 3, kind: input, shape index: {}]   ;;  %s5646_s4 = inlined_call_operand.vmem [shape: f32[1,128], index: 4, kind: input, shape index: {}]   ;;  %s5647_s5 = inlined_call_operand.hbm [shape: f32[2,256,128], index: 5, kind: output, shape index: {}]  }
   0x1   :  { %12 = vsyncpa [#allocation4 + $0x1], 0  ;;  %s4356_s18 = smov 0   ;;  %s4358_s19 = smov 0  }
   0x2   :  { %s4360_s20 = smov 0   ;;  %s4362_s21 = smov 0  }
   0x3 LB: > { %s4377_s22 = sadd.s32 4294967295, %s4320_s21   ;;  %s3127_s23 = sadd.s32 4294967294, %s4320_s21   ;;  %s4320_s21 = sphi %s4362_s21, %s5661_s21   ;;  %s4316_s20 = sphi %s4360_s20, %s5660_s20   ;;  %s4312_s19 = sphi %s4358_s19, %s5659_s19   ;;  %s4308_s18 = sphi %s4356_s18, %s5658_s18  }
   0x4   : > { %s4381_s24 = sadd.s32 1, %s4320_s21   ;;  %s135_s25 = sadd.s32 1, %s4316_s20 }
   0x5   : > { %s132_s26 = ssub.s32 %s4320_s21, %s4381_s24  ;;  %p145_p0 = scmp.ne.s32.totalorder %s4316_s20, %s4312_s19 }
   0x6   : > { %p133_p1 = scmp.eq.s32.totalorder %s132_s26, 0  ;;  %p146_p2 = scmp.eq.s32.totalorder %s4377_s22, 1 }
   0x7   : > { %p151_p3 = scmp.ne.s32.totalorder %s4312_s19, %s4308_s18  ;;  %p152_p4 = scmp.eq.s32.totalorder %s3127_s23, 1 }
   0x8   : > { %s4392_s27 = scalar_select %p133_p1, %s4316_s20, %s135_s25  }
   0x9   : > { %p4394_p5 = por %p146_p2, %p145_p0  ;;  %p4398_p6 = por %p152_p4, %p151_p3 }
   0xa   : > { %p3130_p7 = scmp.ge.s32.totalorder %s4320_s21, 1  ;;  %p190_p8 = scmp.lt.s32.totalorder %s4320_s21, 3 }
   0xc   : > { %p191_p9 = pnand %p3130_p7, %p190_p8 }
   0xd   : > { %v4161_v0 = vld [vmem:[%s5643_s1] sm:$0xff] (!%p191_p9)   ;;  %p218_p10 = scmp.lt.s32.totalorder (!%p191_p9), %s4377_s22, 1  ;;  %v4162_v1 = vld [vmem:[%s5643_s1 + $0x8] sm:$0xff] (!%p191_p9)   ;;  %v4163_v2 = vld [vmem:[%s5643_s1 + $0x10] sm:$0xff] (!%p191_p9)   ;;  %vm640_vm0 = vcmask (!%p191_p9), 1040384   ;;  %vm787_vm2 = vcmask (!%p191_p9), 1047559  }
   0xe   : > { %194 = sbr.rel (%p191_p9) target bundleno = 824 (0x338), region = 40  ;;  %3767 = vmatprep.subr.bf16.mxu1 (!%p191_p9), %v4161_v0  ;;  %v4164_v3 = vld [vmem:[%s5643_s1 + $0x18] sm:$0xff] (!%p191_p9)   ;;  %v4165_v5 = vld [vmem:[%s5643_s1 + $0x20] sm:$0xff] (!%p191_p9)   ;;  %v4166_v6 = vld [vmem:[%s5643_s1 + $0x28] sm:$0xff] (!%p191_p9)   ;;  %vm641_vm1 = vsmask.f32 (!%p191_p9), 256 }
   0xf   : > { %3768 = vmatpush3.bf16.msra.mxu1 (!%p191_p9), %v4161_v0  ;;  %v4167_v7 = vld [vmem:[%s5643_s1 + $0x30] sm:$0xff] (!%p191_p9)   ;;  %v4168_v8 = vld [vmem:[%s5643_s1 + $0x38] sm:$0xff] (!%p191_p9)   ;;  %v4186_v9 = vld [vmem:[%s5645_s3 + $0x140] sm:$0xff] (!%p191_p9)   ;;  %vm788_vm3 = vsmask.f32 (!%p191_p9), 7966  ;;  %vm1062_vm6 = vcmask (!%p191_p9), 1047552  }
  0x10   : > { %3769 = vmatprep.subr.bf16.mxu1 (!%p191_p9), %v4162_v1  ;;  %v4185_v10 = vld [vmem:[%s5645_s3 + $0x100] sm:$0xff] (!%p191_p9)   ;;  %3815 = vmatprep.subr.bf16.mxu0 (!%p191_p9), %v4186_v9  ;;  %v4189_v12 = vld [vmem:[%s5645_s3 + $0x148] sm:$0xff] (!%p191_p9)   ;;  %v4191_v30 = vld [vmem:[%s5645_s3 + $0x110] sm:$0xff] (!%p191_p9)   ;;  %vm1063_vm7 = vsmask.f32 (!%p191_p9), 7938  ;;  %s215_s13 = sand.u32 (!%p191_p9), 1, %s4312_s19  }
  0x11   : > { %3816 = vmatpush3.bf16.msra.mxu0 (!%p191_p9), %v4186_v9  ;;  %v4187_v14 = vld [vmem:[%s5645_s3 + $0xc0] sm:$0xff] (!%p191_p9)   ;;  %v4188_v15 = vld [vmem:[%s5645_s3 + $0x108] sm:$0xff] (!%p191_p9)   ;;  %v4192_v31 = vld [vmem:[%s5645_s3 + $0x150] sm:$0xff] (!%p191_p9)   ;;  %vm1177_vm8 = vsmask.f32 (!%p191_p9), 7424  ;;  %s3131_s16 = sshll.u32 (!%p191_p9), %s215_s13, 8 }
  0x12   : > { %3817 = vmatprep.subr.bf16.mxu0 (!%p191_p9), %v4189_v12  ;;  %v4190_v16 = vld [vmem:[%s5645_s3 + $0xc8] sm:$0xff] (!%p191_p9)   ;;  %v4193_v32 = vld [vmem:[%s5645_s3 + $0xd0] sm:$0xff] (!%p191_p9)   ;;  %v4194_v33 = vld [vmem:[%s5645_s3 + $0x118] sm:$0xff] (!%p191_p9)   ;;  %s5500_s17 = scalar_lea.vmem (!%p191_p9), [#allocation3], %s3131_s16  ;;  %s3334_s23 = sshll.u32 (!%p191_p9), %s4377_s22, 12 }
  0x13   : > { %3770 = vmatpush3.bf16.msra.mxu1 (!%p191_p9), %v4162_v1  ;;  %v4195_v34 = vld [vmem:[%s5645_s3 + $0x158] sm:$0xff] (!%p191_p9)   ;;  %v4197_v36 = vld [vmem:[%s5645_s3 + $0x120] sm:$0xff] (!%p191_p9)   ;;  %v4200_v39 = vld [vmem:[%s5645_s3 + $0x128] sm:$0xff] (!%p191_p9)   ;;  %s3065_s25 = sshll.u32 (!%p191_p9), %s5500_s17, 4  ;;  %s5592_s6 = scalar_lea.hbm (!%p191_p9), %s5647_s5, %s3334_s23  ;;  %s5594_s25 = int_to_ptr.vmem [resolvable:$true] %s3065_s25 }
  0x14   : > { %3771 = vmatprep.subr.bf16.mxu1 (!%p191_p9), %v4163_v2  ;;  %v4196_v35 = vld [vmem:[%s5645_s3 + $0xd8] sm:$0xff] (!%p191_p9)   ;;  %v4198_v37 = vld [vmem:[%s5645_s3 + $0x160] sm:$0xff] (!%p191_p9)   ;;  %vm4499_vm4 = vmand (!%p191_p9), %vm640_vm0, %vm641_vm1  ;;  %s4258_s7 = scalar_lea.vmem (!%p191_p9), %s5594_s25, 4096  ;;  %s4323_s8 = smov (!%p191_p9), [#allocation3]  }
  0x15   : > { %s219_s9 = scalar_select %p218_p10, %s4377_s22, 1  ;;  %3818 = vmatpush3.bf16.msra.mxu0 %v4189_v12  ;;  %v4199_v38 = vld [vmem:[%s5645_s3 + $0xe0] sm:$0xff]   ;;  %v652_v41 = vld [vmem:[#allocation2 + $0x30] sm:$0x1]  ;;  %v655_v44 = vld [vmem:[#allocation2 + $0x38] sm:$0x1] }
  0x16   : > { %3819 = vmatprep.subr.bf16.mxu0 %v4192_v31  ;;  %v658_v42 = vld [vmem:[#allocation2 + $0x40] sm:$0x1]  ;;  %v653_v43 = vsel %vm4499_vm4, 0, %v652_v41  ;;  %vm4507_vm5 = vmand %vm787_vm2, %vm788_vm3  ;;  %v799_v47 = vld [vmem:[#allocation2 + $0x30] sm:$0x80]  ;;  %v656_v48 = vsel %vm4499_vm4, 0, %v655_v44  ;;  %p4259_p11 = scmp.ne.s32.totalorder %s5594_s25, %s4258_s7 }
  0x17   : > { %s3333_s12 = sshll.u32 %s219_s9, 7  ;;  %3772 = vmatpush3.bf16.msra.mxu1 %v4163_v2  ;;  %v659_v45 = vsel %vm4499_vm4, 0, %v658_v42  ;;  %654 = vst [vmem:[#allocation2 + $0x30] sm:$0x1] %v653_v43  ;;  %v800_v49 = vsel %vm4507_vm5, 0, %v799_v47  ;;  %v4201_v2 = vld [vmem:[%s5645_s3 + $0x168] sm:$0xff]   ;;  %vm4748_vm9 = vmand %vm1062_vm6, %vm1063_vm7 }
  0x18   : > { %s4418_s15 = scalar_lea.vmem %s5642_s0, %s3333_s12  ;;  %3773 = vmatprep.subr.bf16.mxu1 %v4164_v3  ;;  %660 = vst [vmem:[#allocation2 + $0x40] sm:$0x1] %v659_v45  ;;  %v802_v50 = vld [vmem:[#allocation2 + $0x38] sm:$0x80]  ;;  %v805_v51 = vld [vmem:[#allocation2 + $0x40] sm:$0x80]  ;;  %vm4755_vm10 = vmand %vm1062_vm6, %vm1177_vm8  ;;  %p4260_p12 = pnand %p4259_p11, %p4394_p5 }
  0x19   : > { %v4169_v4 = vld [vmem:[%s4418_s15] sm:$0xff]   ;;  %v4170_v11 = vld [vmem:[%s4418_s15 + $0x8] sm:$0xff]   ;;  %v4171_v13 = vld [vmem:[%s4418_s15 + $0x10] sm:$0xff]   ;;  %3820 = vmatpush3.bf16.msra.mxu0 %v4192_v31  ;;  %657 = vst [vmem:[#allocation2 + $0x38] sm:$0x1] %v656_v48  ;;  %v803_v52 = vsel %vm4507_vm5, 0, %v802_v50 }
  0x1a   : > { %3783 = vmatprep.mubr.bf16.mxu1 %v4169_v4  ;;  %v4172_v17 = vld [vmem:[%s4418_s15 + $0x18] sm:$0xff]   ;;  %v4173_v18 = vld [vmem:[%s4418_s15 + $0x20] sm:$0xff]   ;;  %v4174_v19 = vld [vmem:[%s4418_s15 + $0x28] sm:$0xff]   ;;  %3821 = vmatprep.subr.bf16.mxu0 %v4195_v34  ;;  %801 = vst [vmem:[#allocation2 + $0x30] sm:$0x80] %v800_v49  ;;  %v806_v53 = vsel %vm4507_vm5, 0, %v805_v51  ;;  %p4261_p13 = pneg %p4260_p12 }
  0x1b   : > { %3774 = vmatpush3.bf16.msra.mxu1 %v4164_v3  ;;  %v4175_v20 = vld [vmem:[%s4418_s15 + $0x30] sm:$0xff]   ;;  %v4176_v21 = vld [vmem:[%s4418_s15 + $0x38] sm:$0xff]   ;;  %v4177_v22 = vld [vmem:[%s4418_s15 + $0x40] sm:$0xff]   ;;  %804 = vst [vmem:[#allocation2 + $0x38] sm:$0x80] %v803_v52  ;;  %s5601_s22 = scalar_lea.sflag [#allocation4], %s215_s13 }
  0x1c   : > { %3775 = vmatprep.subr.bf16.mxu1 %v4165_v5  ;;  %v4178_v23 = vld [vmem:[%s4418_s15 + $0x48] sm:$0xff]   ;;  %v4179_v24 = vld [vmem:[%s4418_s15 + $0x50] sm:$0xff]   ;;  %v4180_v25 = vld [vmem:[%s4418_s15 + $0x58] sm:$0xff]   ;;  %807 = vst [vmem:[#allocation2 + $0x40] sm:$0x80] %v806_v53  ;;  %s4262_s9 = sshll.u32 %s4323_s8, 4  ;;  %s4263_s9 = int_to_ptr.vmem [resolvable:$false] %s4262_s9 }
  0x1d   : > { %v4181_v26 = vld [vmem:[%s4418_s15 + $0x60] sm:$0xff]   ;;  %v4182_v27 = vld [vmem:[%s4418_s15 + $0x68] sm:$0xff]   ;;  %v4183_v28 = vld [vmem:[%s4418_s15 + $0x70] sm:$0xff]   ;;  %3822 = vmatpush3.bf16.msra.mxu0 %v4195_v34  ;;  %s4264_s10 = scalar_lea.vmem %s4263_s9, 8192  ;;  %p4265_p0 = scmp.lt.s32.totalorder %s5594_s25, %s4263_s9 }
  0x1e   : > { %v4184_v29 = vld [vmem:[%s4418_s15 + $0x78] sm:$0xff]   ;;  %3823 = vmatprep.subr.bf16.mxu0 %v4198_v37  ;;  %v646_v55 = vld [vmem:[#allocation2 + $0x20] sm:$0x1]  ;;  %v649_v58 = vld [vmem:[#allocation2 + $0x28] sm:$0x1]  ;;  %p4266_p1 = scmp.lt.s32.totalorder %s4264_s10, %s4258_s7 }
  0x1f   : > { %3776 = vmatpush3.bf16.msra.mxu1 %v4165_v5  ;;  %v643_v54 = vld [vmem:[#allocation2 + $0x18] sm:$0x1]  ;;  %v647_v57 = vsel %vm4499_vm4, 0, %v646_v55  ;;  %v790_v59 = vld [vmem:[#allocation2 + $0x18] sm:$0x80]  ;;  %v650_v60 = vsel %vm4499_vm4, 0, %v649_v58 }
  0x20   : > { %3777 = vmatprep.subr.bf16.mxu1 %v4166_v6  ;;  %v644_v56 = vsel %vm4499_vm4, 0, %v643_v54  ;;  %648 = vst [vmem:[#allocation2 + $0x20] sm:$0x1] %v647_v57  ;;  %v791_v61 = vsel %vm4507_vm5, 0, %v790_v59  ;;  %v793_v62 = vld [vmem:[#allocation2 + $0x20] sm:$0x80]  ;;  %p4267_p2 = por %p4266_p1, %p4265_p0 }
  0x21   : > { %3824 = vmatpush3.bf16.msra.mxu0 %v4198_v37  ;;  %645 = vst [vmem:[#allocation2 + $0x18] sm:$0x1] %v644_v56  ;;  %v796_v63 = vld [vmem:[#allocation2 + $0x28] sm:$0x80]  ;;  %651 = vst [vmem:[#allocation2 + $0x28] sm:$0x1] %v650_v60 }
  0x22   : > { %792 = vst [vmem:[#allocation2 + $0x18] sm:$0x80] %v791_v61  ;;  %v794_v0 = vsel %vm4507_vm5, 0, %v793_v62  ;;  %v797_v1 = vsel %vm4507_vm5, 0, %v796_v63  ;;  %v4202_v3 = vld [vmem:[%s5645_s3 + $0xe8] sm:$0xff]   ;;  %v4203_v4 = vld [vmem:[%s5645_s3 + $0x130] sm:$0xff]   ;;  %3825 = vmatprep.subr.bf16.mxu0 %v4201_v2  ;;  %p4268_p3 = pnand %p4267_p2, %p4261_p13 }
  0x23   : > { %3778 = vmatpush3.bf16.msra.mxu1 %v4166_v6  ;;  %795 = vst [vmem:[#allocation2 + $0x20] sm:$0x80] %v794_v0  ;;  %798 = vst [vmem:[#allocation2 + $0x28] sm:$0x80] %v797_v1  ;;  %v4204_v5 = vld [vmem:[%s5645_s3 + $0x170] sm:$0xff]   ;;  %v4206_v9 = vld [vmem:[%s5645_s3 + $0x138] sm:$0xff]  }
  0x24   : > { %3779 = vmatprep.subr.bf16.mxu1 %v4167_v7  ;;  %v4205_v6 = vld [vmem:[%s5645_s3 + $0xf0] sm:$0xff]   ;;  %v814_v31 = vld [vmem:[#allocation2 + $0x58] sm:$0x80]  ;;  %v691_v37 = vld [vmem:[#allocation2 + $0x98] sm:$0x1] }
  0x25   : > { %3826 = vmatpush3.bf16.msra.mxu0 %v4201_v2  ;;  %v676_v12 = vld [vmem:[#allocation2 + $0x70] sm:$0x1]  ;;  %v692_v41 = vsel %vm4499_vm4, 0, %v691_v37  ;;  %v838_v43 = vld [vmem:[#allocation2 + $0x98] sm:$0x80]  ;;  %v4225_v40 = vld [vmem:[%s5645_s3 + $0x1c0] sm:$0xff]  }
  0x26   : > { %3827 = vmatprep.subr.bf16.mxu0 %v4204_v5  ;;  %v688_v34 = vld [vmem:[#allocation2 + $0x90] sm:$0x1]  ;;  %v841_v44 = vld [vmem:[#allocation2 + $0xa0] sm:$0x80]  ;;  %693 = vst [vmem:[#allocation2 + $0x98] sm:$0x1] %v692_v41 }
  0x27   : > { %3780 = vmatpush3.bf16.msra.mxu1 %v4167_v7  ;;  %v670_v7 = vld [vmem:[#allocation2 + $0x60] sm:$0x1]  ;;  %v839_v45 = vsel %vm4507_vm5, 0, %v838_v43  ;;  %v842_v47 = vsel %vm4507_vm5, 0, %v841_v44  ;;  %v679_v48 = vld [vmem:[#allocation2 + $0x78] sm:$0x1] }
  0x28   : > { %3781 = vmatprep.subr.bf16.mxu1 %v4168_v8  ;;  %v682_v49 = vld [vmem:[#allocation2 + $0x80] sm:$0x1]  ;;  %840 = vst [vmem:[#allocation2 + $0x98] sm:$0x80] %v839_v45  ;;  %843 = vst [vmem:[#allocation2 + $0xa0] sm:$0x80] %v842_v47 }
  0x29   : > { %3828 = vmatpush3.bf16.msra.mxu0 %v4204_v5  ;;  %v680_v50 = vsel %vm4499_vm4, 0, %v679_v48  ;;  %v683_v51 = vsel %vm4499_vm4, 0, %v682_v49  ;;  %v685_v52 = vld [vmem:[#allocation2 + $0x88] sm:$0x1]  ;;  %v826_v54 = vld [vmem:[#allocation2 + $0x78] sm:$0x80] }
  0x2a   : > { %681 = vst [vmem:[#allocation2 + $0x78] sm:$0x1] %v680_v50  ;;  %684 = vst [vmem:[#allocation2 + $0x80] sm:$0x1] %v683_v51  ;;  %v686_v53 = vsel %vm4499_vm4, 0, %v685_v52  ;;  %v827_v56 = vsel %vm4507_vm5, 0, %v826_v54 }
  0x2b   : > { %3782 = vmatpush3.bf16.msra.mxu1 %v4168_v8  ;;  %v673_v8 = vld [vmem:[#allocation2 + $0x68] sm:$0x1]  ;;  %v829_v55 = vld [vmem:[#allocation2 + $0x80] sm:$0x80]  ;;  %687 = vst [vmem:[#allocation2 + $0x88] sm:$0x1] %v686_v53 }
  0x2c   : > { %3359 = vmatprep.subr.bf16.mxu1 %v4185_v10  ;;  %v671_v10 = vsel %vm4499_vm4, 0, %v670_v7  ;;  %v830_v57 = vsel %vm4507_vm5, 0, %v829_v55  ;;  %v832_v58 = vld [vmem:[#allocation2 + $0x88] sm:$0x80]  ;;  %828 = vst [vmem:[#allocation2 + $0x78] sm:$0x80] %v827_v56 }
  0x2d   : > { %672 = vst [vmem:[#allocation2 + $0x60] sm:$0x1] %v671_v10  ;;  %831 = vst [vmem:[#allocation2 + $0x80] sm:$0x80] %v830_v57  ;;  %v833_v59 = vsel %vm4507_vm5, 0, %v832_v58 }
  0x2e   : > { %3784 = vmatmul.mubr.bf16.vlgmr.msra.gmra.mrb[0].mxu1 %v4170_v11  ;;  %v674_v11 = vsel %vm4499_vm4, 0, %v673_v8  ;;  %834 = vst [vmem:[#allocation2 + $0x88] sm:$0x80] %v833_v59  ;;  %v706_v60 = vld [vmem:[#allocation2 + $0xc0] sm:$0x1] }
  0x2f   : > { %3787 = vmatprep.mubr.bf16.mxu1 %v4171_v13  ;;  %3360 = vmatpush3.bf16.msra.mxu1 %v4187_v14  ;;  %v4207_v13 = vld [vmem:[%s5645_s3 + $0x178] sm:$0xff]   ;;  %675 = vst [vmem:[#allocation2 + $0x68] sm:$0x1] %v674_v11  ;;  %v677_v14 = vsel %vm4499_vm4, 0, %v676_v12  ;;  %v712_v61 = vld [vmem:[#allocation2 + $0xd0] sm:$0x1] }
  0x30   : > { %3361 = vmatprep.subr.bf16.mxu1 %v4188_v15  ;;  %v817_v15 = vld [vmem:[#allocation2 + $0x60] sm:$0x80]  ;;  %678 = vst [vmem:[#allocation2 + $0x70] sm:$0x1] %v677_v14  ;;  %3829 = vmatprep.subr.bf16.mxu0 %v4207_v13  ;;  %v707_v62 = vsel %vm4499_vm4, 0, %v706_v60  ;;  %v713_v0 = vsel %vm4499_vm4, 0, %v712_v61 }
  0x31   : > { %3830 = vmatpush3.bf16.msra.mxu0 %v4207_v13  ;;  %v709_v63 = vld [vmem:[#allocation2 + $0xc8] sm:$0x1]  ;;  %v853_v1 = vld [vmem:[#allocation2 + $0xc0] sm:$0x80]  ;;  %708 = vst [vmem:[#allocation2 + $0xc0] sm:$0x1] %v707_v62 }
  0x32   : > { %v710_v2 = vsel %vm4499_vm4, 0, %v709_v63  ;;  %714 = vst [vmem:[#allocation2 + $0xd0] sm:$0x1] %v713_v0  ;;  %v697_v7 = vld [vmem:[#allocation2 + $0xa8] sm:$0x1]  ;;  %v4209_v8 = vld [vmem:[%s5645_s3 + $0x40] sm:$0xff]  }
  0x33   : > { %3362 = vmatpush3.bf16.msra.mxu1 %v4190_v16  ;;  %v820_v16 = vld [vmem:[#allocation2 + $0x68] sm:$0x80]  ;;  %711 = vst [vmem:[#allocation2 + $0xc8] sm:$0x1] %v710_v2  ;;  %v698_v10 = vsel %vm4499_vm4, 0, %v697_v7  ;;  %3495 = vmatprep.subr.bf16.mxu0 %v4209_v8 }
  0x34   : > { %3363 = vmatprep.subr.bf16.mxu1 %v4191_v30  ;;  %v811_v30 = vld [vmem:[#allocation2 + $0x50] sm:$0x80]  ;;  %v700_v11 = vld [vmem:[#allocation2 + $0xb0] sm:$0x1]  ;;  %699 = vst [vmem:[#allocation2 + $0xa8] sm:$0x1] %v698_v10 }
  0x35   : > { %v701_v12 = vsel %vm4499_vm4, 0, %v700_v11  ;;  %v703_v13 = vld [vmem:[#allocation2 + $0xb8] sm:$0x1]  ;;  %v844_v14 = vld [vmem:[#allocation2 + $0xa8] sm:$0x80] }
  0x36   : > { %3788 = vmatmul.mubr.bf16.gmra.mrb[4].mxu1 %v4172_v17  ;;  %v818_v17 = vsel %vm4507_vm5, 0, %v817_v15  ;;  %702 = vst [vmem:[#allocation2 + $0xb0] sm:$0x1] %v701_v12  ;;  %v704_v15 = vsel %vm4499_vm4, 0, %v703_v13  ;;  %v721_v37 = vld [vmem:[#allocation2 + $0xe8] sm:$0x1] }
  0x37   : > { %3791 = vmatprep.mubr.bf16.mxu1 %v4173_v18  ;;  %3364 = vmatpush3.bf16.msra.mxu1 %v4193_v32  ;;  %v821_v18 = vsel %vm4507_vm5, 0, %v820_v16  ;;  %819 = vst [vmem:[#allocation2 + $0x60] sm:$0x80] %v818_v17  ;;  %v812_v32 = vsel %vm4507_vm5, 0, %v811_v30  ;;  %v845_v16 = vsel %vm4507_vm5, 0, %v844_v14 }
  0x38   : > { %3365 = vmatprep.subr.bf16.mxu1 %v4194_v33  ;;  %822 = vst [vmem:[#allocation2 + $0x68] sm:$0x80] %v821_v18  ;;  %v815_v33 = vsel %vm4507_vm5, 0, %v814_v31  ;;  %813 = vst [vmem:[#allocation2 + $0x50] sm:$0x80] %v812_v32 }
  0x39   : > { %816 = vst [vmem:[#allocation2 + $0x58] sm:$0x80] %v815_v33  ;;  %v847_v17 = vld [vmem:[#allocation2 + $0xb0] sm:$0x80]  ;;  %705 = vst [vmem:[#allocation2 + $0xb8] sm:$0x1] %v704_v15 }
  0x3a   : > { %846 = vst [vmem:[#allocation2 + $0xa8] sm:$0x80] %v845_v16  ;;  %v848_v18 = vsel %vm4507_vm5, 0, %v847_v17  ;;  %v877_v31 = vld [vmem:[#allocation2 + $0x100] sm:$0x80] }
  0x3b   : > { %3366 = vmatpush3.bf16.msra.mxu1 %v4196_v35  ;;  %v694_v35 = vld [vmem:[#allocation2 + $0xa0] sm:$0x1]  ;;  %849 = vst [vmem:[#allocation2 + $0xb0] sm:$0x80] %v848_v18  ;;  %v715_v32 = vld [vmem:[#allocation2 + $0xd8] sm:$0x1] }
  0x3c   : > { %3367 = vmatprep.subr.bf16.mxu1 %v4197_v36  ;;  %v689_v36 = vsel %vm4499_vm4, 0, %v688_v34  ;;  %v878_v33 = vsel %vm4507_vm5, 0, %v877_v31  ;;  %v716_v34 = vsel %vm4499_vm4, 0, %v715_v32  ;;  %v868_v44 = vld [vmem:[#allocation2 + $0xe8] sm:$0x80] }
  0x3d   : > { %690 = vst [vmem:[#allocation2 + $0x90] sm:$0x1] %v689_v36  ;;  %879 = vst [vmem:[#allocation2 + $0x100] sm:$0x80] %v878_v33  ;;  %v869_v45 = vsel %vm4507_vm5, 0, %v868_v44 }
  0x3e   : > { %3792 = vmatmul.mubr.bf16.gmra.mrb[8].mxu1 %v4174_v19  ;;  %v823_v19 = vld [vmem:[#allocation2 + $0x70] sm:$0x80]  ;;  %717 = vst [vmem:[#allocation2 + $0xd8] sm:$0x1] %v716_v34  ;;  %v742_v47 = vld [vmem:[#allocation2 + $0x120] sm:$0x1] }
  0x3f   : > { %3795 = vmatprep.mubr.bf16.mxu1 %v4175_v20  ;;  %3368 = vmatpush3.bf16.msra.mxu1 %v4199_v38  ;;  %v661_v20 = vld [vmem:[#allocation2 + $0x48] sm:$0x1]  ;;  %v695_v38 = vsel %vm4499_vm4, 0, %v694_v35  ;;  %v718_v35 = vld [vmem:[#allocation2 + $0xe0] sm:$0x1]  ;;  %v743_v49 = vsel %vm4499_vm4, 0, %v742_v47 }
  0x40   : > { %3369 = vmatprep.subr.bf16.mxu1 %v4200_v39  ;;  %v835_v39 = vld [vmem:[#allocation2 + $0x90] sm:$0x80]  ;;  %696 = vst [vmem:[#allocation2 + $0xa0] sm:$0x1] %v695_v38  ;;  %v719_v36 = vsel %vm4499_vm4, 0, %v718_v35 }
  0x41   : > { %v836_v42 = vsel %vm4507_vm5, 0, %v835_v39  ;;  %v862_v38 = vld [vmem:[#allocation2 + $0xd8] sm:$0x80]  ;;  %720 = vst [vmem:[#allocation2 + $0xe0] sm:$0x1] %v719_v36  ;;  %v722_v39 = vsel %vm4499_vm4, 0, %v721_v37 }
  0x42   : > { %837 = vst [vmem:[#allocation2 + $0x90] sm:$0x80] %v836_v42  ;;  %v863_v41 = vsel %vm4507_vm5, 0, %v862_v38  ;;  %v865_v42 = vld [vmem:[#allocation2 + $0xe0] sm:$0x80] }
  0x43   : > { %3370 = vmatpush3.bf16.msra.mxu1 %v4202_v3  ;;  %v854_v3 = vsel %vm4507_vm5, 0, %v853_v1  ;;  %723 = vst [vmem:[#allocation2 + $0xe8] sm:$0x1] %v722_v39  ;;  %864 = vst [vmem:[#allocation2 + $0xd8] sm:$0x80] %v863_v41  ;;  %v866_v43 = vsel %vm4507_vm5, 0, %v865_v42 }
  0x44   : > { %3371 = vmatprep.subr.bf16.mxu1 %v4203_v4  ;;  %v856_v4 = vld [vmem:[#allocation2 + $0xc8] sm:$0x80]  ;;  %855 = vst [vmem:[#allocation2 + $0xc0] sm:$0x80] %v854_v3  ;;  %867 = vst [vmem:[#allocation2 + $0xe0] sm:$0x80] %v866_v43 }
  0x45   : > { %v857_v5 = vsel %vm4507_vm5, 0, %v856_v4  ;;  %v748_v48 = vld [vmem:[#allocation2 + $0x130] sm:$0x1]  ;;  %870 = vst [vmem:[#allocation2 + $0xe8] sm:$0x80] %v869_v45 }
  0x46   : > { %3796 = vmatmul.mubr.bf16.gmra.mrb[12].mxu1 %v4176_v21  ;;  %v824_v21 = vsel %vm4507_vm5, 0, %v823_v19  ;;  %858 = vst [vmem:[#allocation2 + $0xc8] sm:$0x80] %v857_v5  ;;  %v850_v19 = vld [vmem:[#allocation2 + $0xb8] sm:$0x80]  ;;  %v749_v51 = vsel %vm4499_vm4, 0, %v748_v48 }
  0x47   : > { %3799 = vmatprep.mubr.bf16.mxu1 %v4177_v22  ;;  %3372 = vmatpush3.bf16.msra.mxu1 %v4205_v6  ;;  %v662_v22 = vsel %vm4499_vm4, 0, %v661_v20  ;;  %825 = vst [vmem:[#allocation2 + $0x70] sm:$0x80] %v824_v21  ;;  %v859_v6 = vld [vmem:[#allocation2 + $0xd0] sm:$0x80]  ;;  %v851_v20 = vsel %vm4507_vm5, 0, %v850_v19 }
  0x48   : > { %3373 = vmatprep.subr.bf16.mxu1 %v4206_v9  ;;  %663 = vst [vmem:[#allocation2 + $0x48] sm:$0x1] %v662_v22  ;;  %v860_v9 = vsel %vm4507_vm5, 0, %v859_v6  ;;  %v724_v21 = vld [vmem:[#allocation2 + $0xf0] sm:$0x1] }
  0x49   : > { %861 = vst [vmem:[#allocation2 + $0xd0] sm:$0x80] %v860_v9  ;;  %v730_v22 = vld [vmem:[#allocation2 + $0x100] sm:$0x1]  ;;  %852 = vst [vmem:[#allocation2 + $0xb8] sm:$0x80] %v851_v20 }
  0x4a   : > { %v745_v50 = vld [vmem:[#allocation2 + $0x128] sm:$0x1]  ;;  %v889_v52 = vld [vmem:[#allocation2 + $0x120] sm:$0x80]  ;;  %744 = vst [vmem:[#allocation2 + $0x120] sm:$0x1] %v743_v49 }
  0x4b   : > { %v746_v53 = vsel %vm4499_vm4, 0, %v745_v50  ;;  %750 = vst [vmem:[#allocation2 + $0x130] sm:$0x1] %v749_v51  ;;  %v890_v54 = vsel %vm4507_vm5, 0, %v889_v52  ;;  %v892_v55 = vld [vmem:[#allocation2 + $0x128] sm:$0x80] }
  0x4c   : > { %747 = vst [vmem:[#allocation2 + $0x128] sm:$0x1] %v746_v53  ;;  %891 = vst [vmem:[#allocation2 + $0x120] sm:$0x80] %v890_v54  ;;  %v893_v56 = vsel %vm4507_vm5, 0, %v892_v55 }
  0x4d   : > { %v895_v57 = vld [vmem:[#allocation2 + $0x130] sm:$0x80]  ;;  %v733_v58 = vld [vmem:[#allocation2 + $0x108] sm:$0x1]  ;;  %894 = vst [vmem:[#allocation2 + $0x128] sm:$0x80] %v893_v56 }
  0x4e   : > { %3800 = vmatmul.mubr.bf16.gmra.mrb[16].mxu1 %v4178_v23  ;;  %v664_v23 = vld [vmem:[#allocation2 + $0x50] sm:$0x1]  ;;  %v896_v59 = vsel %vm4507_vm5, 0, %v895_v57  ;;  %v734_v60 = vsel %vm4499_vm4, 0, %v733_v58  ;;  %v739_v63 = vld [vmem:[#allocation2 + $0x118] sm:$0x1] }
  0x4f   : > { %3803 = vmatprep.mubr.bf16.mxu1 %v4179_v24  ;;  %v4208_v24 = vld [vmem:[%s5645_s3 + $0xf8] sm:$0xff]   ;;  %v736_v61 = vld [vmem:[#allocation2 + $0x110] sm:$0x1]  ;;  %897 = vst [vmem:[#allocation2 + $0x130] sm:$0x80] %v896_v59  ;;  %v740_v1 = vsel %vm4499_vm4, 0, %v739_v63 }
  0x50   : > { %3374 = vmatpush3.bf16.msra.mxu1 %v4208_v24  ;;  %v727_v24 = vld [vmem:[#allocation2 + $0xf8] sm:$0x1]  ;;  %735 = vst [vmem:[#allocation2 + $0x108] sm:$0x1] %v734_v60  ;;  %v737_v62 = vsel %vm4499_vm4, 0, %v736_v61  ;;  %v4322_v57 = vmov 0  }
  0x51   : > { %v880_v0 = vld [vmem:[#allocation2 + $0x108] sm:$0x80]  ;;  %738 = vst [vmem:[#allocation2 + $0x110] sm:$0x1] %v737_v62  ;;  %v883_v3 = vld [vmem:[#allocation2 + $0x110] sm:$0x80]  ;;  %3631 = vmatprep.subr.bf16.mxu1 %v4225_v40 }
  0x52   : > { %v881_v2 = vsel %vm4507_vm5, 0, %v880_v0  ;;  %741 = vst [vmem:[#allocation2 + $0x118] sm:$0x1] %v740_v1  ;;  %v884_v4 = vsel %vm4507_vm5, 0, %v883_v3  ;;  %v886_v5 = vld [vmem:[#allocation2 + $0x118] sm:$0x80] }
  0x53   : > { %882 = vst [vmem:[#allocation2 + $0x108] sm:$0x80] %v881_v2  ;;  %885 = vst [vmem:[#allocation2 + $0x110] sm:$0x80] %v884_v4  ;;  %v887_v6 = vsel %vm4507_vm5, 0, %v886_v5 }
  0x54   : > { %v760_v7 = vld [vmem:[#allocation2 + $0x150] sm:$0x1]  ;;  %v766_v8 = vld [vmem:[#allocation2 + $0x160] sm:$0x1]  ;;  %888 = vst [vmem:[#allocation2 + $0x118] sm:$0x80] %v887_v6 }
  0x55   : > { %v761_v9 = vsel %vm4499_vm4, 0, %v760_v7  ;;  %v763_v10 = vld [vmem:[#allocation2 + $0x158] sm:$0x1]  ;;  %v767_v11 = vsel %vm4499_vm4, 0, %v766_v8  ;;  %v907_v12 = vld [vmem:[#allocation2 + $0x150] sm:$0x80] }
  0x56   : > { %3804 = vmatmul.mubr.bf16.gmra.mrb[20].mxu1 %v4180_v25  ;;  %v665_v25 = vsel %vm4499_vm4, 0, %v664_v23  ;;  %v725_v23 = vsel %vm4499_vm4, 0, %v724_v21  ;;  %762 = vst [vmem:[#allocation2 + $0x150] sm:$0x1] %v761_v9  ;;  %v764_v13 = vsel %vm4499_vm4, 0, %v763_v10  ;;  %v908_v14 = vsel %vm4507_vm5, 0, %v907_v12 }
  0x57   : > { %3807 = vmatprep.mubr.bf16.mxu1 %v4181_v26  ;;  %v667_v26 = vld [vmem:[#allocation2 + $0x58] sm:$0x1]  ;;  %666 = vst [vmem:[#allocation2 + $0x50] sm:$0x1] %v665_v25  ;;  %v731_v25 = vsel %vm4499_vm4, 0, %v730_v22  ;;  %633 = vst [vmem:[#allocation2 + $0x8] sm:$0xff] %v4322_v57 }
  0x58   : > { %726 = vst [vmem:[#allocation2 + $0xf0] sm:$0x1] %v725_v23  ;;  %732 = vst [vmem:[#allocation2 + $0x100] sm:$0x1] %v731_v25  ;;  %v910_v15 = vld [vmem:[#allocation2 + $0x158] sm:$0x80] }
  0x59   : > { %768 = vst [vmem:[#allocation2 + $0x160] sm:$0x1] %v767_v11  ;;  %765 = vst [vmem:[#allocation2 + $0x158] sm:$0x1] %v764_v13  ;;  %v911_v16 = vsel %vm4507_vm5, 0, %v910_v15 }
  0x5a   : > { %909 = vst [vmem:[#allocation2 + $0x150] sm:$0x80] %v908_v14  ;;  %v913_v17 = vld [vmem:[#allocation2 + $0x160] sm:$0x80]  ;;  %v751_v18 = vld [vmem:[#allocation2 + $0x138] sm:$0x1] }
  0x5b   : > { %912 = vst [vmem:[#allocation2 + $0x158] sm:$0x80] %v911_v16  ;;  %v914_v19 = vsel %vm4507_vm5, 0, %v913_v17  ;;  %v752_v20 = vsel %vm4499_vm4, 0, %v751_v18  ;;  %v754_v21 = vld [vmem:[#allocation2 + $0x140] sm:$0x1] }
  0x5c   : > { %915 = vst [vmem:[#allocation2 + $0x160] sm:$0x80] %v914_v19  ;;  %753 = vst [vmem:[#allocation2 + $0x138] sm:$0x1] %v752_v20  ;;  %v755_v22 = vsel %vm4499_vm4, 0, %v754_v21  ;;  %v4230_v18 = vld [vmem:[%s5645_s3 + $0x88] sm:$0xff]  }
  0x5d   : > { %v757_v23 = vld [vmem:[#allocation2 + $0x148] sm:$0x1]  ;;  %756 = vst [vmem:[#allocation2 + $0x140] sm:$0x1] %v755_v22  ;;  %v778_v31 = vld [vmem:[#allocation2 + $0x180] sm:$0x1] }
  0x5e   : > { %3808 = vmatmul.mubr.bf16.gmra.mrb[24].mxu1 %v4182_v27  ;;  %v808_v27 = vld [vmem:[#allocation2 + $0x48] sm:$0x80]  ;;  %v758_v25 = vsel %vm4499_vm4, 0, %v757_v23  ;;  %v779_v32 = vsel %vm4499_vm4, 0, %v778_v31  ;;  %v781_v33 = vld [vmem:[#allocation2 + $0x188] sm:$0x1] }
  0x5f   : > { %3811 = vmatprep.mubr.bf16.mxu1 %v4183_v28  ;;  %v668_v28 = vsel %vm4499_vm4, 0, %v667_v26  ;;  %v871_v26 = vld [vmem:[#allocation2 + $0xf0] sm:$0x80]  ;;  %759 = vst [vmem:[#allocation2 + $0x148] sm:$0x1] %v758_v25  ;;  %v782_v35 = vsel %vm4499_vm4, 0, %v781_v33 }
  0x60   : > { %669 = vst [vmem:[#allocation2 + $0x58] sm:$0x1] %v668_v28  ;;  %v872_v28 = vsel %vm4507_vm5, 0, %v871_v26  ;;  %v784_v34 = vld [vmem:[#allocation2 + $0x190] sm:$0x1]  ;;  %v1179_v31 = vld [vmem:[#allocation2 + $0x28] sm:$0xff] }
  0x61   : > { %873 = vst [vmem:[#allocation2 + $0xf0] sm:$0x80] %v872_v28  ;;  %780 = vst [vmem:[#allocation2 + $0x180] sm:$0x1] %v779_v32  ;;  %v785_v36 = vsel %vm4499_vm4, 0, %v784_v34  ;;  %v1068_v22 = vld [vmem:[#allocation2 + $0x30] sm:$0xff] }
  0x62   : > { %v925_v37 = vld [vmem:[#allocation2 + $0x180] sm:$0x80]  ;;  %783 = vst [vmem:[#allocation2 + $0x188] sm:$0x1] %v782_v35  ;;  %786 = vst [vmem:[#allocation2 + $0x190] sm:$0x1] %v785_v36 }
  0x63   : > { %v926_v38 = vsel %vm4507_vm5, 0, %v925_v37  ;;  %v928_v39 = vld [vmem:[#allocation2 + $0x188] sm:$0x80]  ;;  %v931_v41 = vld [vmem:[#allocation2 + $0x190] sm:$0x80] }
  0x64   : > { %927 = vst [vmem:[#allocation2 + $0x180] sm:$0x80] %v926_v38  ;;  %v929_v42 = vsel %vm4507_vm5, 0, %v928_v39  ;;  %v932_v43 = vsel %vm4507_vm5, 0, %v931_v41  ;;  %v769_v44 = vld [vmem:[#allocation2 + $0x168] sm:$0x1] }
  0x65   : > { %930 = vst [vmem:[#allocation2 + $0x188] sm:$0x80] %v929_v42  ;;  %933 = vst [vmem:[#allocation2 + $0x190] sm:$0x80] %v932_v43  ;;  %v770_v45 = vsel %vm4499_vm4, 0, %v769_v44  ;;  %v4210_v42 = vld [vmem:[%s5645_s3] sm:$0xff]  }
  0x66   : > { %3812 = vmatmul.mubr.bf16.gmra.mrb[28].mxu1 %v4184_v29  ;;  %v809_v29 = vsel %vm4507_vm5, 0, %v808_v27  ;;  %v728_v27 = vsel %vm4499_vm4, 0, %v727_v24  ;;  %v898_v24 = vld [vmem:[#allocation2 + $0x138] sm:$0x80]  ;;  %v772_v47 = vld [vmem:[#allocation2 + $0x170] sm:$0x1] }
  0x67   : > { %810 = vst [vmem:[#allocation2 + $0x48] sm:$0x80] %v809_v29  ;;  %v874_v29 = vld [vmem:[#allocation2 + $0xf8] sm:$0x80]  ;;  %729 = vst [vmem:[#allocation2 + $0xf8] sm:$0x1] %v728_v27 }
  0x68   : > { %v875_v30 = vsel %vm4507_vm5, 0, %v874_v29  ;;  %v899_v26 = vsel %vm4507_vm5, 0, %v898_v24  ;;  %v901_v27 = vld [vmem:[#allocation2 + $0x140] sm:$0x80]  ;;  %v904_v29 = vld [vmem:[#allocation2 + $0x148] sm:$0x80] }
  0x69   : > { %876 = vst [vmem:[#allocation2 + $0xf8] sm:$0x80] %v875_v30  ;;  %900 = vst [vmem:[#allocation2 + $0x138] sm:$0x80] %v899_v26  ;;  %v902_v28 = vsel %vm4507_vm5, 0, %v901_v27  ;;  %v905_v30 = vsel %vm4507_vm5, 0, %v904_v29 }
  0x6a   : > { %903 = vst [vmem:[#allocation2 + $0x140] sm:$0x80] %v902_v28  ;;  %906 = vst [vmem:[#allocation2 + $0x148] sm:$0x80] %v905_v30  ;;  %v775_v48 = vld [vmem:[#allocation2 + $0x178] sm:$0x1] }
  0x6b   : > { %771 = vst [vmem:[#allocation2 + $0x168] sm:$0x1] %v770_v45  ;;  %v773_v49 = vsel %vm4499_vm4, 0, %v772_v47  ;;  %v776_v50 = vsel %vm4499_vm4, 0, %v775_v48  ;;  %v916_v51 = vld [vmem:[#allocation2 + $0x168] sm:$0x80] }
  0x6c   : > { %774 = vst [vmem:[#allocation2 + $0x170] sm:$0x1] %v773_v49  ;;  %777 = vst [vmem:[#allocation2 + $0x178] sm:$0x1] %v776_v50  ;;  %v917_v52 = vsel %vm4507_vm5, 0, %v916_v51  ;;  %v1182_v24 = vld [vmem:[#allocation2 + $0x40] sm:$0xff] }
  0x6d   : > { %v919_v53 = vld [vmem:[#allocation2 + $0x170] sm:$0x80]  ;;  %v922_v54 = vld [vmem:[#allocation2 + $0x178] sm:$0x80]  ;;  %918 = vst [vmem:[#allocation2 + $0x168] sm:$0x80] %v917_v52 }
  0x6e   : > { %v920_v55 = vsel %vm4507_vm5, 0, %v919_v53  ;;  %v923_v56 = vsel %vm4507_vm5, 0, %v922_v54  ;;  %v4733_v58 = vld [vmem:[%s5644_s2] ss:$0 sm:$0xff]  ;;  %v1065_v30 = vld [vmem:[#allocation2 + $0x18] sm:$0xff]  ;;  %v4211_v49 = vld [vmem:[%s5645_s3 + $0x48] sm:$0xff]  }
  0x6f   : > { %921 = vst [vmem:[#allocation2 + $0x170] sm:$0x80] %v920_v55  ;;  %924 = vst [vmem:[#allocation2 + $0x178] sm:$0x80] %v923_v56  ;;  %v4226_v43 = vld [vmem:[%s5645_s3 + $0x180] sm:$0xff]   ;;  %v4228_v50 = vld [vmem:[%s5645_s3 + $0x1c8] sm:$0xff]  }
 0x101   : > { %v3785_v59 = vpop.f32.mrb[0].mxu1 }
 0x102   : > { %v466_v60 = vadd.f32 %v3785_v59, %v4733_v58  ;;  %v457_v46 = vpop.f32.mrb[1].mxu1 }
 0x103   : > { %v458_v61 = vadd.f32 %v4733_v58, %v457_v46  ;;  %v3786_v62 = vpop.f32.mrb[2].mxu1  ;;  %v1074_v46 = vld [vmem:[#allocation2 + $0x60] sm:$0xff] }
 0x104   : > { %v469_v63 = vadd.f32 %v3786_v62, %v4733_v58  ;;  %v460_v0 = vpop.f32.mrb[3].mxu1  ;;  %v586_v2 = vmax.f32 %v466_v60, 0.0 }
 0x105   : > { %v461_v1 = vadd.f32 %v4733_v58, %v460_v0  ;;  %v584_v4 = vmax.f32 %v458_v61, 0.0  ;;  %v4212_v0 = vld [vmem:[%s5645_s3 + $0x8] sm:$0xff]  }
 0x106   : > { %v587_v3 = vmax.f32 %v469_v63, 0.0 }
 0x107   : > { %v585_v5 = vmax.f32 %v461_v1, 0.0  ;;  %v4229_v1 = vld [vmem:[%s5645_s3 + $0x188] sm:$0xff]  }
 0x108   : > { %v4739_v6 = vpack.c.bf16 %v587_v3, %v586_v2  ;;  %v1188_v2 = vld [vmem:[#allocation2 + $0x70] sm:$0xff] }
 0x109   : > { %v616_v7 = vpack.c.bf16 %v585_v5, %v584_v4  ;;  %v3789_v8 = vpop.f32.mrb[4].mxu1 }
 0x10a   : > { %v942_v9 = vshrl.u32 %v4739_v6, 16  ;;  %v945_v10 = vshll.u32 %v4739_v6, 16  ;;  %1114 = vst [vmem:[#allocation2 + $0x38] sm:$0xff] %v4739_v6  ;;  %v482_v11 = vadd.f32 %v3789_v8, %v4733_v58  ;;  %v473_v12 = vpop.f32.mrb[5].mxu1 }
 0x10b   : > { %v935_v13 = vshrl.u32 %v616_v7, 16  ;;  %v938_v14 = vshll.u32 %v616_v7, 16  ;;  %1113 = vst [vmem:[#allocation2 + $0x20] sm:$0xff] %v616_v7  ;;  %v474_v15 = vadd.f32 %v4733_v58, %v473_v12  ;;  %v3790_v16 = vpop.f32.mrb[6].mxu1  ;;  %1596 = vmatprep.mubr.bf16.mxu1 %v616_v7  ;;  %v4231_v7 = vld [vmem:[%s5645_s3 + $0x1d0] sm:$0xff]  }
 0x10c   : > { %v944_v17 = vrot.slane %v942_v9, 7  ;;  %v1131_v19 = vrot.slane %v945_v10, 1  ;;  %v485_v20 = vadd.f32 %v3790_v16, %v4733_v58  ;;  %v476_v21 = vpop.f32.mrb[7].mxu1  ;;  %v590_v32 = vmax.f32 %v482_v11, 0.0  ;;  %v1185_v11 = vld [vmem:[#allocation2 + $0x58] sm:$0xff] }
 0x10d   : > { %v937_v25 = vrot.slane %v935_v13, 7  ;;  %v1129_v26 = vrot.slane %v938_v14, 1  ;;  %v477_v27 = vadd.f32 %v4733_v58, %v476_v21  ;;  %v588_v36 = vmax.f32 %v474_v15, 0.0 }
 0x10e   : > { %v947_v28 = vor.u32 %v945_v10, %v944_v17  ;;  %v1132_v29 = vor.u32 %v1131_v19, %v942_v9  ;;  %v591_v33 = vmax.f32 %v485_v20, 0.0  ;;  %v1071_v10 = vld [vmem:[#allocation2 + $0x48] sm:$0xff] }
 0x10f   : > { %v940_v34 = vor.u32 %v938_v14, %v937_v25  ;;  %v1130_v35 = vor.u32 %v1129_v26, %v935_v13  ;;  %v589_v37 = vmax.f32 %v477_v27, 0.0 }
 0x110   : > { %v4762_v38 = vsel %vm4748_vm9, %v947_v28, %v1068_v22  ;;  %v1183_v39 = vsel %vm4755_vm10, %v1132_v29, %v1182_v24  ;;  %v4766_v41 = vpack.c.bf16 %v591_v33, %v590_v32  ;;  %v4214_v22 = vld [vmem:[%s5645_s3 + $0x10] sm:$0xff]   ;;  %v4215_v29 = vld [vmem:[%s5645_s3 + $0x58] sm:$0xff]  }
 0x111   : > { %1070 = vst [vmem:[#allocation2 + $0x30] sm:$0xff] %v4762_v38  ;;  %1184 = vst [vmem:[#allocation2 + $0x40] sm:$0xff] %v1183_v39  ;;  %v1066_v44 = vsel %vm4748_vm9, %v940_v34, %v1065_v30  ;;  %v1180_v45 = vsel %vm4755_vm10, %v1130_v35, %v1179_v31  ;;  %v4779_v47 = vpack.c.bf16 %v589_v37, %v588_v36  ;;  %v3793_v48 = vpop.f32.mrb[8].mxu1  ;;  %v4232_v24 = vld [vmem:[%s5645_s3 + $0x190] sm:$0xff]   ;;  %v4234_v30 = vld [vmem:[%s5645_s3 + $0x1d8] sm:$0xff]  }
 0x112   : > { %1067 = vst [vmem:[#allocation2 + $0x18] sm:$0xff] %v1066_v44  ;;  %1181 = vst [vmem:[#allocation2 + $0x28] sm:$0xff] %v1180_v45  ;;  %v956_v51 = vshrl.u32 %v4766_v41, 16  ;;  %v959_v52 = vshll.u32 %v4766_v41, 16  ;;  %v498_v53 = vadd.f32 %v3793_v48, %v4733_v58  ;;  %v489_v54 = vpop.f32.mrb[9].mxu1  ;;  %1597 = vmatmul.mubr.bf16.vlgmr.msra.gmra.mrb[32].mxu1 %v1066_v44  ;;  %3831 = vmatprep.mubr.bf16.mxu0 %v1180_v45  ;;  %v1231_v23 = vld [vmem:[#allocation2 + $0x20] sm:$0xff] }
 0x113   : > { %1116 = vst [vmem:[#allocation2 + $0x68] sm:$0xff] %v4766_v41  ;;  %v949_v55 = vshrl.u32 %v4779_v47, 16  ;;  %v952_v56 = vshll.u32 %v4779_v47, 16  ;;  %1115 = vst [vmem:[#allocation2 + $0x50] sm:$0xff] %v4779_v47  ;;  %v490_v40 = vadd.f32 %v4733_v58, %v489_v54  ;;  %v3794_v59 = vpop.f32.mrb[10].mxu1  ;;  %1604 = vmatprep.mubr.bf16.mxu1 %v4739_v6  ;;  %3832 = vmatmul.mubr.bf16.vlgmr.msra.gmra.mrb[0].mxu0 %v1183_v39  ;;  %v4213_v6 = vld [vmem:[%s5645_s3 + $0x50] sm:$0xff]  }
 0x114   : > { %v958_v60 = vrot.slane %v956_v51, 7  ;;  %v1135_v61 = vrot.slane %v959_v52, 1  ;;  %v501_v62 = vadd.f32 %v3794_v59, %v4733_v58  ;;  %v492_v63 = vpop.f32.mrb[11].mxu1  ;;  %3496 = vmatpush3.bf16.msra.mxu0 %v4210_v42  ;;  %3632 = vmatpush3.bf16.msra.mxu1 %v4226_v43  ;;  %v594_v12 = vmax.f32 %v498_v53, 0.0  ;;  %v1080_v43 = vld [vmem:[#allocation2 + $0x90] sm:$0xff]  ;;  %v4217_v53 = vld [vmem:[%s5645_s3 + $0x60] sm:$0xff]  }
 0x115   : > { %v951_v3 = vrot.slane %v949_v55, 7  ;;  %v1133_v4 = vrot.slane %v952_v56, 1  ;;  %v493_v5 = vadd.f32 %v4733_v58, %v492_v63  ;;  %3497 = vmatprep.subr.bf16.mxu0 %v4211_v49  ;;  %3633 = vmatprep.subr.bf16.mxu1 %v4228_v50  ;;  %v592_v16 = vmax.f32 %v490_v40, 0.0  ;;  %v4235_v49 = vld [vmem:[%s5645_s3 + $0x198] sm:$0xff]   ;;  %v1194_v50 = vld [vmem:[#allocation2 + $0xa0] sm:$0xff]  ;;  %v1191_v59 = vld [vmem:[#allocation2 + $0x88] sm:$0xff] }
 0x116   : > { %v961_v8 = vor.u32 %v959_v52, %v958_v60  ;;  %v1136_v9 = vor.u32 %v1135_v61, %v956_v51  ;;  %v595_v13 = vmax.f32 %v501_v62, 0.0  ;;  %v4237_v54 = vld [vmem:[%s5645_s3 + $0x1e0] sm:$0xff]   ;;  %v1077_v40 = vld [vmem:[#allocation2 + $0x78] sm:$0xff] }
 0x117   : > { %v954_v14 = vor.u32 %v952_v56, %v951_v3  ;;  %v1134_v15 = vor.u32 %v1133_v4, %v949_v55  ;;  %v593_v17 = vmax.f32 %v493_v5, 0.0  ;;  %v4218_v4 = vld [vmem:[%s5645_s3 + $0x20] sm:$0xff]  }
 0x118   : > { %v4812_v19 = vsel %vm4748_vm9, %v961_v8, %v1074_v46  ;;  %v1189_v20 = vsel %vm4755_vm10, %v1136_v9, %v1188_v2  ;;  %v4816_v21 = vpack.c.bf16 %v595_v13, %v594_v12  ;;  %3498 = vmatpush3.bf16.msra.mxu0 %v4212_v0  ;;  %3634 = vmatpush3.bf16.msra.mxu1 %v4229_v1  ;;  %v4238_v5 = vld [vmem:[%s5645_s3 + $0x1a0] sm:$0xff]  }
 0x119   : > { %1076 = vst [vmem:[#allocation2 + $0x60] sm:$0xff] %v4812_v19  ;;  %1190 = vst [vmem:[#allocation2 + $0x70] sm:$0xff] %v1189_v20  ;;  %v4827_v25 = vsel %vm4748_vm9, %v954_v14, %v1071_v10  ;;  %v1186_v26 = vsel %vm4755_vm10, %v1134_v15, %v1185_v11  ;;  %v4831_v27 = vpack.c.bf16 %v593_v17, %v592_v16  ;;  %v3797_v28 = vpop.f32.mrb[12].mxu1  ;;  %3499 = vmatprep.subr.bf16.mxu0 %v4213_v6  ;;  %v4219_v10 = vld [vmem:[%s5645_s3 + $0x68] sm:$0xff]  }
 0x11a   : > { %3635 = vmatprep.subr.bf16.mxu1 %v4231_v7  ;;  %1073 = vst [vmem:[#allocation2 + $0x48] sm:$0xff] %v4827_v25  ;;  %1187 = vst [vmem:[#allocation2 + $0x58] sm:$0xff] %v1186_v26  ;;  %v970_v31 = vshrl.u32 %v4816_v21, 16  ;;  %v973_v32 = vshll.u32 %v4816_v21, 16  ;;  %v514_v33 = vadd.f32 %v3797_v28, %v4733_v58  ;;  %v505_v34 = vpop.f32.mrb[13].mxu1  ;;  %1605 = vmatmul.mubr.bf16.gmra.mrb[36].mxu1 %v4762_v38  ;;  %v4216_v38 = vld [vmem:[%s5645_s3 + $0x18] sm:$0xff]  }
 0x11b   : > { %1118 = vst [vmem:[#allocation2 + $0x98] sm:$0xff] %v4816_v21  ;;  %3835 = vmatprep.mubr.bf16.mxu0 %v1186_v26  ;;  %v963_v35 = vshrl.u32 %v4831_v27, 16  ;;  %v966_v36 = vshll.u32 %v4831_v27, 16  ;;  %1117 = vst [vmem:[#allocation2 + $0x80] sm:$0xff] %v4831_v27  ;;  %v506_v37 = vadd.f32 %v4733_v58, %v505_v34  ;;  %v3798_v39 = vpop.f32.mrb[14].mxu1  ;;  %1612 = vmatprep.mubr.bf16.mxu1 %v4779_v47  ;;  %v4239_v11 = vld [vmem:[%s5645_s3 + $0x1e8] sm:$0xff]  }
 0x11c   : > { %3836 = vmatmul.mubr.bf16.gmra.mrb[4].mxu0 %v1189_v20  ;;  %v972_v42 = vrot.slane %v970_v31, 7  ;;  %v1139_v44 = vrot.slane %v973_v32, 1  ;;  %v517_v45 = vadd.f32 %v3798_v39, %v4733_v58  ;;  %v508_v48 = vpop.f32.mrb[15].mxu1  ;;  %3636 = vmatpush3.bf16.msra.mxu1 %v4232_v24  ;;  %v598_v60 = vmax.f32 %v514_v33, 0.0  ;;  %v1086_v26 = vld [vmem:[#allocation2 + $0xc0] sm:$0xff] }
 0x11d   : > { %3500 = vmatpush3.bf16.msra.mxu0 %v4214_v22  ;;  %v965_v51 = vrot.slane %v963_v35, 7  ;;  %v1137_v47 = vrot.slane %v966_v36, 1  ;;  %v509_v52 = vadd.f32 %v4733_v58, %v508_v48  ;;  %3637 = vmatprep.subr.bf16.mxu1 %v4234_v30  ;;  %v596_v63 = vmax.f32 %v506_v37, 0.0 }
 0x11e   : > { %3501 = vmatprep.subr.bf16.mxu0 %v4215_v29  ;;  %v975_v55 = vor.u32 %v973_v32, %v972_v42  ;;  %v1140_v56 = vor.u32 %v1139_v44, %v970_v31  ;;  %v599_v46 = vmax.f32 %v517_v45, 0.0  ;;  %v4240_v31 = vld [vmem:[%s5645_s3 + $0x1a8] sm:$0xff]   ;;  %v1200_v32 = vld [vmem:[#allocation2 + $0xd0] sm:$0xff] }
 0x11f   : > { %v968_v61 = vor.u32 %v966_v36, %v965_v51  ;;  %v1138_v62 = vor.u32 %v1137_v47, %v963_v35  ;;  %v597_v0 = vmax.f32 %v509_v52, 0.0  ;;  %v4221_v35 = vld [vmem:[%s5645_s3 + $0x70] sm:$0xff]   ;;  %v1083_v42 = vld [vmem:[#allocation2 + $0xa8] sm:$0xff] }
 0x120   : > { %v1081_v1 = vsel %vm4748_vm9, %v975_v55, %v1080_v43  ;;  %v1195_v2 = vsel %vm4755_vm10, %v1140_v56, %v1194_v50  ;;  %v4868_v3 = vpack.c.bf16 %v599_v46, %v598_v60  ;;  %3638 = vmatpush3.bf16.msra.mxu1 %v4235_v49  ;;  %v4241_v36 = vld [vmem:[%s5645_s3 + $0x1f0] sm:$0xff]   ;;  %v1197_v43 = vld [vmem:[#allocation2 + $0xb8] sm:$0xff] }
 0x121   : > { %3502 = vmatpush3.bf16.msra.mxu0 %v4216_v38  ;;  %1082 = vst [vmem:[#allocation2 + $0x90] sm:$0xff] %v1081_v1  ;;  %1196 = vst [vmem:[#allocation2 + $0xa0] sm:$0xff] %v1195_v2  ;;  %v4878_v6 = vsel %vm4748_vm9, %v968_v61, %v1077_v40  ;;  %v1192_v7 = vsel %vm4755_vm10, %v1138_v62, %v1191_v59  ;;  %v4882_v8 = vpack.c.bf16 %v597_v0, %v596_v63  ;;  %v3801_v9 = vpop.f32.mrb[16].mxu1  ;;  %v4223_v60 = vld [vmem:[%s5645_s3 + $0x78] sm:$0xff]  }
 0x122   : > { %3503 = vmatprep.subr.bf16.mxu0 %v4217_v53  ;;  %3639 = vmatprep.subr.bf16.mxu1 %v4237_v54  ;;  %1079 = vst [vmem:[#allocation2 + $0x78] sm:$0xff] %v4878_v6  ;;  %1193 = vst [vmem:[#allocation2 + $0x88] sm:$0xff] %v1192_v7  ;;  %v984_v12 = vshrl.u32 %v4868_v3, 16  ;;  %v987_v13 = vshll.u32 %v4868_v3, 16  ;;  %v530_v14 = vadd.f32 %v3801_v9, %v4733_v58  ;;  %v521_v15 = vpop.f32.mrb[17].mxu1  ;;  %v4222_v53 = vld [vmem:[%s5645_s3 + $0x30] sm:$0xff]  }
 0x123   : > { %1120 = vst [vmem:[#allocation2 + $0xc8] sm:$0xff] %v4868_v3  ;;  %1613 = vmatmul.mubr.bf16.gmra.mrb[40].mxu1 %v4827_v25  ;;  %3839 = vmatprep.mubr.bf16.mxu0 %v1192_v7  ;;  %v977_v16 = vshrl.u32 %v4882_v8, 16  ;;  %v980_v17 = vshll.u32 %v4882_v8, 16  ;;  %1119 = vst [vmem:[#allocation2 + $0xb0] sm:$0xff] %v4882_v8  ;;  %v522_v20 = vadd.f32 %v4733_v58, %v521_v15  ;;  %v3802_v22 = vpop.f32.mrb[18].mxu1  ;;  %v4220_v25 = vld [vmem:[%s5645_s3 + $0x28] sm:$0xff]  }
 0x124   : > { %1620 = vmatprep.mubr.bf16.mxu1 %v4766_v41  ;;  %3840 = vmatmul.mubr.bf16.gmra.mrb[8].mxu0 %v1195_v2  ;;  %v986_v24 = vrot.slane %v984_v12, 7  ;;  %v1143_v28 = vrot.slane %v987_v13, 1  ;;  %v533_v29 = vadd.f32 %v3802_v22, %v4733_v58  ;;  %v524_v30 = vpop.f32.mrb[19].mxu1  ;;  %v602_v44 = vmax.f32 %v530_v14, 0.0  ;;  %v4242_v54 = vld [vmem:[%s5645_s3 + $0x1b0] sm:$0xff]   ;;  %v4243_v46 = vld [vmem:[%s5645_s3 + $0x1f8] sm:$0xff]  }
 0x125   : > { %3504 = vmatpush3.bf16.msra.mxu0 %v4218_v4  ;;  %3640 = vmatpush3.bf16.msra.mxu1 %v4238_v5  ;;  %v979_v33 = vrot.slane %v977_v16, 7  ;;  %v1141_v41 = vrot.slane %v980_v17, 1  ;;  %v525_v34 = vadd.f32 %v4733_v58, %v524_v30  ;;  %v600_v49 = vmax.f32 %v522_v20, 0.0  ;;  %v1206_v14 = vld [vmem:[#allocation2 + $0x100] sm:$0xff] }
 0x126   : > { %3505 = vmatprep.subr.bf16.mxu0 %v4219_v10  ;;  %3641 = vmatprep.subr.bf16.mxu1 %v4239_v11  ;;  %v989_v37 = vor.u32 %v987_v13, %v986_v24  ;;  %v1144_v39 = vor.u32 %v1143_v28, %v984_v12  ;;  %v603_v45 = vmax.f32 %v533_v29, 0.0  ;;  %v4244_v12 = vld [vmem:[%s5645_s3 + $0x1b8] sm:$0xff]   ;;  %v1092_v13 = vld [vmem:[#allocation2 + $0xf0] sm:$0xff] }
 0x127   : > { %v982_v48 = vor.u32 %v980_v17, %v979_v33  ;;  %v1142_v38 = vor.u32 %v1141_v41, %v977_v16  ;;  %v601_v50 = vmax.f32 %v525_v34, 0.0  ;;  %v4966_v17 = vld [vmem:[%s5645_s3 + $0x80] sm:$0xff]   ;;  %v1089_v24 = vld [vmem:[#allocation2 + $0xd8] sm:$0xff] }
 0x128   : > { %v4917_v51 = vsel %vm4748_vm9, %v989_v37, %v1086_v26  ;;  %v1201_v47 = vsel %vm4755_vm10, %v1144_v39, %v1200_v32  ;;  %v4921_v52 = vpack.c.bf16 %v603_v45, %v602_v44  ;;  %v1203_v26 = vld [vmem:[#allocation2 + $0xe8] sm:$0xff] }
 0x129   : > { %3506 = vmatpush3.bf16.msra.mxu0 %v4220_v25  ;;  %3642 = vmatpush3.bf16.msra.mxu1 %v4240_v31  ;;  %1088 = vst [vmem:[#allocation2 + $0xc0] sm:$0xff] %v4917_v51  ;;  %1202 = vst [vmem:[#allocation2 + $0xd0] sm:$0xff] %v1201_v47  ;;  %v4932_v55 = vsel %vm4748_vm9, %v982_v48, %v1083_v42  ;;  %v1198_v56 = vsel %vm4755_vm10, %v1142_v38, %v1197_v43  ;;  %v3805_v59 = vpop.f32.mrb[20].mxu1 }
 0x12a   : > { %v4936_v40 = vpack.c.bf16 %v601_v50, %v600_v49  ;;  %3507 = vmatprep.subr.bf16.mxu0 %v4221_v35  ;;  %3643 = vmatprep.subr.bf16.mxu1 %v4241_v36  ;;  %1085 = vst [vmem:[#allocation2 + $0xa8] sm:$0xff] %v4932_v55  ;;  %1199 = vst [vmem:[#allocation2 + $0xb8] sm:$0xff] %v1198_v56  ;;  %v998_v61 = vshrl.u32 %v4921_v52, 16  ;;  %v1001_v62 = vshll.u32 %v4921_v52, 16  ;;  %v537_v0 = vpop.f32.mrb[21].mxu1 }
 0x12b   : > { %1122 = vst [vmem:[#allocation2 + $0xf8] sm:$0xff] %v4921_v52  ;;  %v546_v63 = vadd.f32 %v3805_v59, %v4733_v58  ;;  %1621 = vmatmul.mubr.bf16.gmra.mrb[44].mxu1 %v4812_v19  ;;  %3843 = vmatprep.mubr.bf16.mxu0 %v1198_v56  ;;  %v538_v4 = vadd.f32 %v4733_v58, %v537_v0  ;;  %v3806_v5 = vpop.f32.mrb[22].mxu1  ;;  %v4224_v19 = vld [vmem:[%s5645_s3 + $0x38] sm:$0xff]   ;;  %v1098_v59 = vld [vmem:[#allocation2 + $0x120] sm:$0xff]  ;;  %v1095_v0 = vld [vmem:[#allocation2 + $0x108] sm:$0xff] }
 0x12c   : > { %v991_v1 = vshrl.u32 %v4936_v40, 16  ;;  %v994_v2 = vshll.u32 %v4936_v40, 16  ;;  %1121 = vst [vmem:[#allocation2 + $0xe0] sm:$0xff] %v4936_v40  ;;  %1628 = vmatprep.mubr.bf16.mxu1 %v4831_v27  ;;  %3844 = vmatmul.mubr.bf16.gmra.mrb[12].mxu0 %v1201_v47  ;;  %v1000_v7 = vrot.slane %v998_v61, 7  ;;  %v1147_v9 = vrot.slane %v1001_v62, 1  ;;  %v540_v11 = vpop.f32.mrb[23].mxu1 }
 0x12d   : > { %v549_v10 = vadd.f32 %v3806_v5, %v4733_v58  ;;  %3508 = vmatpush3.bf16.msra.mxu0 %v4222_v53  ;;  %3644 = vmatpush3.bf16.msra.mxu1 %v4242_v54  ;;  %v541_v16 = vadd.f32 %v4733_v58, %v540_v11  ;;  %v606_v28 = vmax.f32 %v546_v63, 0.0  ;;  %v604_v31 = vmax.f32 %v538_v4, 0.0 }
 0x12e   : > { %v993_v15 = vrot.slane %v991_v1, 7  ;;  %v1145_v27 = vrot.slane %v994_v2, 1  ;;  %3509 = vmatprep.subr.bf16.mxu0 %v4223_v60  ;;  %3645 = vmatprep.subr.bf16.mxu1 %v4243_v46  ;;  %v1003_v20 = vor.u32 %v1001_v62, %v1000_v7  ;;  %v1148_v22 = vor.u32 %v1147_v9, %v998_v61 }
 0x12f   : > { %v607_v29 = vmax.f32 %v549_v10, 0.0  ;;  %v605_v32 = vmax.f32 %v541_v16, 0.0 }
 0x130   : > { %v996_v30 = vor.u32 %v994_v2, %v993_v15  ;;  %v1146_v25 = vor.u32 %v1145_v27, %v991_v1  ;;  %v4970_v33 = vsel %vm4748_vm9, %v1003_v20, %v1092_v13  ;;  %v1207_v41 = vsel %vm4755_vm10, %v1148_v22, %v1206_v14  ;;  %v1209_v1 = vld [vmem:[#allocation2 + $0x118] sm:$0xff]  ;;  %v5016_v27 = vld [vmem:[#allocation2 + $0x90] sm:$0xff] }
 0x131   : > { %v4974_v34 = vpack.c.bf16 %v607_v29, %v606_v28  ;;  %3510 = vmatpush3.bf16.msra.mxu0 %v4224_v19  ;;  %3646 = vmatpush3.bf16.msra.mxu1 %v4244_v12  ;;  %1094 = vst [vmem:[#allocation2 + $0xf0] sm:$0xff] %v4970_v33  ;;  %1208 = vst [vmem:[#allocation2 + $0x100] sm:$0xff] %v1207_v41  ;;  %v4983_v37 = vpack.c.bf16 %v605_v32, %v604_v31  ;;  %v3809_v39 = vpop.f32.mrb[24].mxu1 }
 0x132   : > { %v4979_v35 = vsel %vm4748_vm9, %v996_v30, %v1089_v24  ;;  %v1204_v36 = vsel %vm4755_vm10, %v1146_v25, %v1203_v26  ;;  %3863 = vmatprep.subr.bf16.mxu0 %v4966_v17  ;;  %v562_v44 = vadd.f32 %v3809_v39, %v4733_v58  ;;  %v553_v45 = vpop.f32.mrb[25].mxu1  ;;  %v1218_v39 = vld [vmem:[#allocation2 + $0x160] sm:$0xff] }
 0x133   : > { %1091 = vst [vmem:[#allocation2 + $0xd8] sm:$0xff] %v4979_v35  ;;  %1205 = vst [vmem:[#allocation2 + $0xe8] sm:$0xff] %v1204_v36  ;;  %v1012_v42 = vshrl.u32 %v4974_v34, 16  ;;  %v1015_v43 = vshll.u32 %v4974_v34, 16  ;;  %1629 = vmatmul.mubr.bf16.gmra.mrb[48].mxu1 %v4878_v6  ;;  %3847 = vmatprep.mubr.bf16.mxu0 %v1204_v36  ;;  %v1005_v48 = vshrl.u32 %v4983_v37, 16  ;;  %v1008_v38 = vshll.u32 %v4983_v37, 16 }
 0x134   : > { %1124 = vst [vmem:[#allocation2 + $0x128] sm:$0xff] %v4974_v34  ;;  %1123 = vst [vmem:[#allocation2 + $0x110] sm:$0xff] %v4983_v37  ;;  %v554_v49 = vadd.f32 %v4733_v58, %v553_v45  ;;  %v3810_v50 = vpop.f32.mrb[26].mxu1  ;;  %1636 = vmatprep.mubr.bf16.mxu1 %v4816_v21  ;;  %3848 = vmatmul.mubr.bf16.gmra.mrb[16].mxu0 %v1207_v41  ;;  %v1212_v6 = vld [vmem:[#allocation2 + $0x130] sm:$0xff]  ;;  %v610_v2 = vmax.f32 %v562_v44, 0.0 }
 0x135   : > { %v1014_v47 = vrot.slane %v1012_v42, 7  ;;  %v1151_v53 = vrot.slane %v1015_v43, 1  ;;  %v565_v54 = vadd.f32 %v3810_v50, %v4733_v58  ;;  %v556_v56 = vpop.f32.mrb[27].mxu1  ;;  %v1007_v60 = vrot.slane %v1005_v48, 7  ;;  %v1104_v36 = vld [vmem:[#allocation2 + $0x150] sm:$0xff] }
 0x136   : > { %v1149_v46 = vrot.slane %v1008_v38, 1  ;;  %v557_v61 = vadd.f32 %v4733_v58, %v556_v56  ;;  %v608_v7 = vmax.f32 %v554_v49, 0.0  ;;  %v1215_v49 = vld [vmem:[#allocation2 + $0x148] sm:$0xff] }
 0x137   : > { %v1017_v62 = vor.u32 %v1015_v43, %v1014_v47  ;;  %v1152_v63 = vor.u32 %v1151_v53, %v1012_v42  ;;  %v611_v4 = vmax.f32 %v565_v54, 0.0  ;;  %v1010_v5 = vor.u32 %v1008_v38, %v1007_v60  ;;  %v1101_v38 = vld [vmem:[#allocation2 + $0x138] sm:$0xff] }
 0x138   : > { %v1150_v21 = vor.u32 %v1149_v46, %v1005_v48  ;;  %v609_v9 = vmax.f32 %v557_v61, 0.0 }
 0x139   : > { %v5001_v10 = vsel %vm4748_vm9, %v1017_v62, %v1098_v59  ;;  %v1213_v11 = vsel %vm4755_vm10, %v1152_v63, %v1212_v6  ;;  %v5005_v19 = vpack.c.bf16 %v611_v4, %v610_v2  ;;  %v5010_v12 = vsel %vm4748_vm9, %v1010_v5, %v1095_v0  ;;  %v3813_v15 = vpop.f32.mrb[28].mxu1  ;;  %v1110_v5 = vld [vmem:[#allocation2 + $0x180] sm:$0xff] }
 0x13a   : > { %1100 = vst [vmem:[#allocation2 + $0x120] sm:$0xff] %v5001_v10  ;;  %1214 = vst [vmem:[#allocation2 + $0x130] sm:$0xff] %v1213_v11  ;;  %v1210_v13 = vsel %vm4755_vm10, %v1150_v21, %v1209_v1  ;;  %v5014_v14 = vpack.c.bf16 %v609_v9, %v608_v7  ;;  %v578_v22 = vadd.f32 %v3813_v15, %v4733_v58  ;;  %v569_v24 = vpop.f32.mrb[29].mxu1  ;;  %v1224_v21 = vld [vmem:[#allocation2 + $0x190] sm:$0xff]  ;;  %v1221_v15 = vld [vmem:[#allocation2 + $0x178] sm:$0xff] }
 0x13b   : > { %1097 = vst [vmem:[#allocation2 + $0x108] sm:$0xff] %v5010_v12  ;;  %1211 = vst [vmem:[#allocation2 + $0x118] sm:$0xff] %v1210_v13  ;;  %v1026_v16 = vshrl.u32 %v5005_v19, 16  ;;  %v1029_v20 = vshll.u32 %v5005_v19, 16  ;;  %1637 = vmatmul.mubr.bf16.gmra.mrb[52].mxu1 %v5016_v27  ;;  %3851 = vmatprep.mubr.bf16.mxu0 %v1210_v13  ;;  %v570_v29 = vadd.f32 %v4733_v58, %v569_v24  ;;  %v3814_v30 = vpop.f32.mrb[30].mxu1 }
 0x13c   : > { %1126 = vst [vmem:[#allocation2 + $0x158] sm:$0xff] %v5005_v19  ;;  %v1019_v26 = vshrl.u32 %v5014_v14, 16  ;;  %v1022_v28 = vshll.u32 %v5014_v14, 16  ;;  %1125 = vst [vmem:[#allocation2 + $0x140] sm:$0xff] %v5014_v14  ;;  %1644 = vmatprep.mubr.bf16.mxu1 %v4882_v8  ;;  %3852 = vmatmul.mubr.bf16.gmra.mrb[20].mxu0 %v1213_v11  ;;  %v581_v32 = vadd.f32 %v3814_v30, %v4733_v58  ;;  %v572_v41 = vpop.f32.mrb[31].mxu1  ;;  %v614_v50 = vmax.f32 %v578_v22, 0.0 }
 0x13d   : > { %v1028_v25 = vrot.slane %v1026_v16, 7  ;;  %v1155_v31 = vrot.slane %v1029_v20, 1  ;;  %v573_v44 = vadd.f32 %v4733_v58, %v572_v41  ;;  %v612_v54 = vmax.f32 %v570_v29, 0.0  ;;  %v4246_v29 = vld [vmem:[%s5645_s3 + $0xa8] sm:$0xff]   ;;  %v1237_v30 = vld [vmem:[#allocation2 + $0x50] sm:$0xff] }
 0x13e   : > { %v1021_v42 = vrot.slane %v1019_v26, 7  ;;  %v1153_v43 = vrot.slane %v1022_v28, 1  ;;  %v615_v47 = vmax.f32 %v581_v32, 0.0  ;;  %v1236_v32 = vld [vmem:[#allocation2 + $0x48] sm:$0xff] }
 0x13f   : > { %v1031_v45 = vor.u32 %v1029_v20, %v1028_v25  ;;  %v1156_v48 = vor.u32 %v1155_v31, %v1026_v16  ;;  %v613_v56 = vmax.f32 %v573_v44, 0.0  ;;  %v4247_v25 = vld [vmem:[%s5645_s3 + $0xb0] sm:$0xff]   ;;  %v4248_v31 = vld [vmem:[%s5645_s3 + $0xb8] sm:$0xff]   ;;  %v1240_v41 = vld [vmem:[#allocation2 + $0x68] sm:$0xff] }
 0x140   : > { %v1024_v53 = vor.u32 %v1022_v28, %v1021_v42  ;;  %v1154_v8 = vor.u32 %v1153_v43, %v1019_v26  ;;  %v5037_v60 = vpack.c.bf16 %v615_v47, %v614_v50  ;;  %v4236_v28 = vld [vmem:[%s5645_s3 + $0x98] sm:$0xff]   ;;  %v1243_v42 = vld [vmem:[#allocation2 + $0x80] sm:$0xff]  ;;  %v1257_v47 = vld [vmem:[#allocation2 + $0xf0] sm:$0xff] }
 0x141   : > { %v5033_v59 = vsel %vm4748_vm9, %v1031_v45, %v1104_v36  ;;  %v1219_v6 = vsel %vm4755_vm10, %v1156_v48, %v1218_v39  ;;  %v5048_v61 = vpack.c.bf16 %v613_v56, %v612_v54  ;;  %v5116_v36 = vld [vmem:[%s5645_s3 + $0x200] sm:$0xff]   ;;  %v1242_v43 = vld [vmem:[#allocation2 + $0x78] sm:$0xff]  ;;  %v1249_v45 = vld [vmem:[#allocation2 + $0xb0] sm:$0xff] }
 0x142   : > { %1106 = vst [vmem:[#allocation2 + $0x150] sm:$0xff] %v5033_v59  ;;  %1220 = vst [vmem:[#allocation2 + $0x160] sm:$0xff] %v1219_v6  ;;  %v5042_v58 = vsel %vm4748_vm9, %v1024_v53, %v1101_v38  ;;  %v5046_v46 = vsel %vm4755_vm10, %v1154_v8, %v1215_v49  ;;  %v1040_v62 = vshrl.u32 %v5037_v60, 16  ;;  %v1043_v63 = vshll.u32 %v5037_v60, 16  ;;  %v1239_v39 = vld [vmem:[#allocation2 + $0x60] sm:$0xff]  ;;  %v1246_v44 = vld [vmem:[#allocation2 + $0x98] sm:$0xff] }
 0x143   : > { %1103 = vst [vmem:[#allocation2 + $0x138] sm:$0xff] %v5042_v58  ;;  %1217 = vst [vmem:[#allocation2 + $0x148] sm:$0xff] %v5046_v46  ;;  %1645 = vmatmul.mubr.bf16.gmra.mrb[56].mxu1 %v4932_v55  ;;  %3855 = vmatprep.mubr.bf16.mxu0 %v5046_v46  ;;  %v1033_v0 = vshrl.u32 %v5048_v61, 16  ;;  %v1036_v1 = vshll.u32 %v5048_v61, 16  ;;  %v1107_v55 = vld [vmem:[#allocation2 + $0x168] sm:$0xff]  ;;  %v1251_v49 = vld [vmem:[#allocation2 + $0xc0] sm:$0xff] }
 0x144   : > { %1128 = vst [vmem:[#allocation2 + $0x188] sm:$0xff] %v5037_v60  ;;  %1127 = vst [vmem:[#allocation2 + $0x170] sm:$0xff] %v5048_v61  ;;  %1652 = vmatprep.mubr.bf16.mxu1 %v4868_v3  ;;  %3856 = vmatmul.mubr.bf16.gmra.mrb[24].mxu0 %v1219_v6  ;;  %v1042_v2 = vrot.slane %v1040_v62, 7  ;;  %v1159_v4 = vrot.slane %v1043_v63, 1  ;;  %v1248_v48 = vld [vmem:[#allocation2 + $0xa8] sm:$0xff]  ;;  %v1258_v50 = vld [vmem:[#allocation2 + $0xf8] sm:$0xff] }
 0x145   : > { %v1035_v7 = vrot.slane %v1033_v0, 7  ;;  %v1157_v9 = vrot.slane %v1036_v1, 1  ;;  %v1252_v38 = vld [vmem:[#allocation2 + $0xc8] sm:$0xff]  ;;  %v5147_v53 = vld [vmem:[#allocation2 + $0x40] sm:$0xff]  ;;  %v4251_v8 = vld [vmem:[%s5645_s3 + $0x210] sm:$0xff]  }
 0x146   : > { %v1045_v11 = vor.u32 %v1043_v63, %v1042_v2  ;;  %v1160_v13 = vor.u32 %v1159_v4, %v1040_v62  ;;  %v4252_v54 = vld [vmem:[%s5645_s3 + $0x218] sm:$0xff]   ;;  %v2384_v56 = vld [vmem:[#allocation2 + $0x128] sm:$0xff]  ;;  %v5161_v6 = vld [vmem:[#allocation2 + $0x70] sm:$0xff] }
 0x147   : > { %v1038_v16 = vor.u32 %v1036_v1, %v1035_v7  ;;  %v1158_v20 = vor.u32 %v1157_v9, %v1033_v0  ;;  %v4253_v62 = vld [vmem:[%s5645_s3 + $0x220] sm:$0xff]   ;;  %v5170_v0 = vld [vmem:[#allocation2 + $0x88] sm:$0xff]  ;;  %v4255_v4 = vld [vmem:[%s5645_s3 + $0x230] sm:$0xff]  }
 0x148   : > { %v5063_v22 = vsel %vm4748_vm9, %v1045_v11, %v1110_v5  ;;  %v1225_v3 = vsel %vm4755_vm10, %v1160_v13, %v1224_v21  ;;  %v2383_v63 = vld [vmem:[#allocation2 + $0x120] sm:$0xff]  ;;  %v5188_v13 = vld [vmem:[#allocation2 + $0xb8] sm:$0xff] }
 0x149   : > { %1112 = vst [vmem:[#allocation2 + $0x180] sm:$0xff] %v5063_v22  ;;  %1226 = vst [vmem:[#allocation2 + $0x190] sm:$0xff] %v1225_v3  ;;  %v5070_v24 = vsel %vm4748_vm9, %v1038_v16, %v1107_v55  ;;  %v5074_v26 = vsel %vm4755_vm10, %v1158_v20, %v1221_v15  ;;  %v5174_v1 = vld [vmem:[#allocation2 + $0xa0] sm:$0xff]  ;;  %v5192_v55 = vld [vmem:[#allocation2 + $0xd0] sm:$0xff] }
 0x14a   : > { %1109 = vst [vmem:[#allocation2 + $0x168] sm:$0xff] %v5070_v24  ;;  %1223 = vst [vmem:[#allocation2 + $0x178] sm:$0xff] %v5074_v26  ;;  %3859 = vmatprep.mubr.bf16.mxu0 %v5074_v26 }
 0x14b   : > { %1653 = vmatmul.mubr.bf16.gmra.mrb[60].mxu1 %v4917_v51  ;;  %v4233_v51 = vld [vmem:[%s5645_s3 + $0x90] sm:$0xff]  }
 0x14c   : > { %1660 = vmatprep.mubr.bf16.mxu1 %v4936_v40  ;;  %3860 = vmatmul.mubr.bf16.gmra.mrb[28].mxu0 %v1225_v3 }
 0x14d   : > { %2062 = vmatprep.mubr.bf16.mxu0 %v4322_v57 }
 0x153   : > { %1661 = vmatmul.mubr.bf16.gmra.mrb[64].mxu1 %v4979_v35 }
 0x154   : > { %1668 = vmatprep.mubr.bf16.mxu1 %v4921_v52  ;;  %2063 = vmatmul.mubr.bf16.vlgmr.msra.gmra.mrb[32].mxu0 %v4322_v57  ;;  %v1230_v52 = vld [vmem:[#allocation2 + $0x18] sm:$0xff] }
 0x155   : > { %3864 = vmatpush3.bf16.msra.mxu0 %v4966_v17  ;;  %2070 = vmatprep.mubr.bf16.mxu0 %v1231_v23  ;;  %v1234_v57 = vld [vmem:[#allocation2 + $0x38] sm:$0xff]  ;;  %v4245_v17 = vld [vmem:[%s5645_s3 + $0xa0] sm:$0xff]   ;;  %v5200_v23 = vld [vmem:[#allocation2 + $0xe8] sm:$0xff] }
 0x156   : > { %3865 = vmatprep.subr.bf16.mxu0 %v4230_v18 }
 0x159   : > { %3866 = vmatpush3.bf16.msra.mxu0 %v4230_v18 }
 0x15a   : > { %3867 = vmatprep.subr.bf16.mxu0 %v4233_v51 }
 0x15b   : > { %1669 = vmatmul.mubr.bf16.gmra.mrb[68].mxu1 %v4970_v33  ;;  %v1233_v33 = vld [vmem:[#allocation2 + $0x30] sm:$0xff] }
 0x15c   : > { %1676 = vmatprep.mubr.bf16.mxu1 %v4983_v37  ;;  %2071 = vmatmul.mubr.bf16.gmra.mrb[36].mxu0 %v1230_v52 }
 0x15d   : > { %2078 = vmatprep.mubr.bf16.mxu0 %v1234_v57  ;;  %3868 = vmatpush3.bf16.msra.mxu0 %v4233_v51 }
 0x15e   : > { %3869 = vmatprep.subr.bf16.mxu0 %v4236_v28 }
 0x161   : > { %3870 = vmatpush3.bf16.msra.mxu0 %v4236_v28 }
 0x162   : > { %3871 = vmatprep.subr.bf16.mxu0 %v4245_v17 }
 0x163   : > { %1677 = vmatmul.mubr.bf16.gmra.mrb[72].mxu1 %v5010_v12 }
 0x164   : > { %1684 = vmatprep.mubr.bf16.mxu1 %v4974_v34  ;;  %2079 = vmatmul.mubr.bf16.gmra.mrb[40].mxu0 %v1233_v33 }
 0x165   : > { %2086 = vmatprep.mubr.bf16.mxu0 %v1237_v30  ;;  %3872 = vmatpush3.bf16.msra.mxu0 %v4245_v17 }
 0x166   : > { %3873 = vmatprep.subr.bf16.mxu0 %v4246_v29 }
 0x169   : > { %3874 = vmatpush3.bf16.msra.mxu0 %v4246_v29 }
 0x16a   : > { %3875 = vmatprep.subr.bf16.mxu0 %v4247_v25 }
 0x16b   : > { %1685 = vmatmul.mubr.bf16.gmra.mrb[76].mxu1 %v5001_v10 }
 0x16c   : > { %1692 = vmatprep.mubr.bf16.mxu1 %v5014_v14  ;;  %2087 = vmatmul.mubr.bf16.gmra.mrb[44].mxu0 %v1236_v32 }
 0x16d   : > { %2094 = vmatprep.mubr.bf16.mxu0 %v1240_v41  ;;  %3876 = vmatpush3.bf16.msra.mxu0 %v4247_v25 }
 0x16e   : > { %3877 = vmatprep.subr.bf16.mxu0 %v4248_v31 }
 0x171   : > { %3878 = vmatpush3.bf16.msra.mxu0 %v4248_v31 }
 0x172   : > { %3911 = vmatprep.subr.bf16.mxu0 %v5116_v36 }
 0x173   : > { %1693 = vmatmul.mubr.bf16.gmra.mrb[80].mxu1 %v5042_v58 }
 0x174   : > { %1700 = vmatprep.mubr.bf16.mxu1 %v5005_v19  ;;  %2095 = vmatmul.mubr.bf16.gmra.mrb[48].mxu0 %v1239_v39 }
 0x175   : > { %2102 = vmatprep.mubr.bf16.mxu0 %v1243_v42 }
 0x17b   : > { %1701 = vmatmul.mubr.bf16.gmra.mrb[84].mxu1 %v5033_v59 }
 0x17c   : > { %1708 = vmatprep.mubr.bf16.mxu1 %v5048_v61  ;;  %2103 = vmatmul.mubr.bf16.gmra.mrb[52].mxu0 %v1242_v43 }
 0x17d   : > { %2110 = vmatprep.mubr.bf16.mxu0 %v1246_v44 }
 0x183   : > { %1709 = vmatmul.mubr.bf16.gmra.mrb[88].mxu1 %v5070_v24 }
 0x184   : > { %1716 = vmatprep.mubr.bf16.mxu1 %v5037_v60  ;;  %2111 = vmatmul.mubr.bf16.gmra.mrb[56].mxu0 %v5016_v27 }
 0x185   : > { %2118 = vmatprep.mubr.bf16.mxu0 %v1249_v45 }
 0x18b   : > { %1717 = vmatmul.mubr.bf16.gmra.mrb[92].mxu1 %v5063_v22 }
 0x18c   : > { %2119 = vmatmul.mubr.bf16.gmra.mrb[60].mxu0 %v1248_v48  ;;  %2626 = vmatprep.mubr.bf16.mxu1 %v1234_v57 }
 0x18d   : > { %2126 = vmatprep.mubr.bf16.mxu0 %v1252_v38 }
 0x193   : > { %2627 = vmatmul.mubr.bf16.vlgmr.msra.gmra.mrb[96].mxu1 %v1233_v33 }
 0x194   : > { %2127 = vmatmul.mubr.bf16.gmra.mrb[64].mxu0 %v1251_v49  ;;  %2634 = vmatprep.mubr.bf16.mxu1 %v1237_v30 }
 0x195   : > { %2134 = vmatprep.mubr.bf16.mxu0 %v4936_v40  ;;  %v2375_v40 = vld [vmem:[#allocation2 + $0xe0] sm:$0xff] }
 0x19b   : > { %2635 = vmatmul.mubr.bf16.gmra.mrb[100].mxu1 %v1236_v32 }
 0x19c   : > { %2135 = vmatmul.mubr.bf16.gmra.mrb[68].mxu0 %v4979_v35  ;;  %2642 = vmatprep.mubr.bf16.mxu1 %v1240_v41  ;;  %v5140_v35 = vld [vmem:[#allocation2 + $0x8] sm:$0xff] }
 0x19d   : > { %2142 = vmatprep.mubr.bf16.mxu0 %v1258_v50 }
 0x1a3   : > { %2643 = vmatmul.mubr.bf16.gmra.mrb[104].mxu1 %v1239_v39 }
 0x1a4   : > { %2143 = vmatmul.mubr.bf16.gmra.mrb[72].mxu0 %v1257_v47  ;;  %2650 = vmatprep.mubr.bf16.mxu1 %v1243_v42 }
 0x1a5   : > { %2150 = vmatprep.mubr.bf16.mxu0 %v4983_v37 }
 0x1ab   : > { %2651 = vmatmul.mubr.bf16.gmra.mrb[108].mxu1 %v1242_v43 }
 0x1ac   : > { %2151 = vmatmul.mubr.bf16.gmra.mrb[76].mxu0 %v5010_v12  ;;  %2658 = vmatprep.mubr.bf16.mxu1 %v1246_v44 }
 0x1ad   : > { %2158 = vmatprep.mubr.bf16.mxu0 %v4974_v34  ;;  %v2374_v34 = vld [vmem:[#allocation2 + $0xd8] sm:$0xff] }
 0x1b3   : > { %2659 = vmatmul.mubr.bf16.gmra.mrb[112].mxu1 %v5016_v27  ;;  %v1232_v27 = vld [vmem:[#allocation2 + $0x28] sm:$0xff] }
 0x1b4   : > { %2159 = vmatmul.mubr.bf16.gmra.mrb[80].mxu0 %v5001_v10  ;;  %2666 = vmatprep.mubr.bf16.mxu1 %v1249_v45  ;;  %v4250_v10 = vld [vmem:[%s5645_s3 + $0x208] sm:$0xff]  }
 0x1b5   : > { %2166 = vmatprep.mubr.bf16.mxu0 %v5014_v14 }
 0x1bb   : > { %2667 = vmatmul.mubr.bf16.gmra.mrb[116].mxu1 %v1248_v48 }
 0x1bc   : > { %2167 = vmatmul.mubr.bf16.gmra.mrb[84].mxu0 %v5042_v58  ;;  %2674 = vmatprep.mubr.bf16.mxu1 %v1252_v38 }
 0x1bd   : > { %2174 = vmatprep.mubr.bf16.mxu0 %v5005_v19 }
 0x1c3   : > { %2675 = vmatmul.mubr.bf16.gmra.mrb[120].mxu1 %v1251_v49 }
 0x1c4   : > { %2175 = vmatmul.mubr.bf16.gmra.mrb[88].mxu0 %v5033_v59  ;;  %2682 = vmatprep.mubr.bf16.mxu1 %v2375_v40 }
 0x1c5   : > { %2182 = vmatprep.mubr.bf16.mxu0 %v5048_v61 }
 0x1cb   : > { %2683 = vmatmul.mubr.bf16.gmra.mrb[124].mxu1 %v2374_v34 }
 0x1cc   : > { %2183 = vmatmul.mubr.bf16.gmra.mrb[92].mxu0 %v5070_v24  ;;  %2690 = vmatprep.mubr.bf16.mxu1 %v1258_v50 }
 0x1cd   : > { %3879 = vmatprep.mubr.bf16.mxu0 %v5140_v35 }
 0x1d3   : > { %2691 = vmatmul.mubr.bf16.gmra.mrb[128].mxu1 %v1257_v47 }
 0x1d4   : > { %3880 = vmatmul.mubr.bf16.vlgmr.msra.gmra.mrb[0].mxu0 %v1232_v27  ;;  %2698 = vmatprep.mubr.bf16.mxu1 %v4983_v37  ;;  %v5158_v37 = vld [vmem:[#allocation2 + $0x58] sm:$0xff] }
 0x1d5   : > { %3912 = vmatpush3.bf16.msra.mxu0 %v5116_v36  ;;  %3883 = vmatprep.mubr.bf16.mxu0 %v5147_v53 }
 0x1d6   : > { %3913 = vmatprep.subr.bf16.mxu0 %v4250_v10 }
 0x1d9   : > { %3914 = vmatpush3.bf16.msra.mxu0 %v4250_v10 }
 0x1da   : > { %3915 = vmatprep.subr.bf16.mxu0 %v4251_v8 }
 0x1db   : > { %2699 = vmatmul.mubr.bf16.gmra.mrb[132].mxu1 %v5010_v12  ;;  %v4254_v12 = vld [vmem:[%s5645_s3 + $0x228] sm:$0xff]  }
 0x1dc   : > { %3884 = vmatmul.mubr.bf16.gmra.mrb[4].mxu0 %v5158_v37  ;;  %2706 = vmatprep.mubr.bf16.mxu1 %v2384_v56 }
 0x1dd   : > { %3887 = vmatprep.mubr.bf16.mxu0 %v5161_v6  ;;  %3916 = vmatpush3.bf16.msra.mxu0 %v4251_v8 }
 0x1de   : > { %3917 = vmatprep.subr.bf16.mxu0 %v4252_v54 }
 0x1e1   : > { %3918 = vmatpush3.bf16.msra.mxu0 %v4252_v54 }
 0x1e2   : > { %3919 = vmatprep.subr.bf16.mxu0 %v4253_v62 }
 0x1e3   : > { %2707 = vmatmul.mubr.bf16.gmra.mrb[136].mxu1 %v2383_v63 }
 0x1e4   : > { %3888 = vmatmul.mubr.bf16.gmra.mrb[8].mxu0 %v5170_v0  ;;  %2714 = vmatprep.mubr.bf16.mxu1 %v5014_v14  ;;  %v4256_v14 = vld [vmem:[%s5645_s3 + $0x238] sm:$0xff]  }
 0x1e5   : > { %3891 = vmatprep.mubr.bf16.mxu0 %v5174_v1  ;;  %3920 = vmatpush3.bf16.msra.mxu0 %v4253_v62  ;;  %v3375_v2 = vpop.f32.mrb[32].mxu1 }
 0x1e6   : > { %3921 = vmatprep.subr.bf16.mxu0 %v4254_v12  ;;  %v3376_v5 = vpop.f32.mrb[33].mxu1 }
 0x1e7   : > { %v5180_v21 = vadd.f32 %v3376_v5, %v3375_v2  ;;  %v3378_v7 = vpop.f32.mrb[34].mxu1 }
 0x1e8   : > { %v3379_v9 = vpop.f32.mrb[35].mxu1 }
 0x1e9   : > { %3922 = vmatpush3.bf16.msra.mxu0 %v4254_v12  ;;  %v5182_v11 = vadd.f32 %v3379_v9, %v3378_v7 }
 0x1ea   : > { %3923 = vmatprep.subr.bf16.mxu0 %v4255_v4 }
 0x1eb   : > { %2715 = vmatmul.mubr.bf16.gmra.mrb[140].mxu1 %v5042_v58 }
 0x1ec   : > { %3892 = vmatmul.mubr.bf16.gmra.mrb[12].mxu0 %v5188_v13  ;;  %2722 = vmatprep.mubr.bf16.mxu1 %v5005_v19  ;;  %v5204_v19 = vld [vmem:[#allocation2 + $0x100] sm:$0xff] }
 0x1ed   : > { %3895 = vmatprep.mubr.bf16.mxu0 %v5192_v55  ;;  %3924 = vmatpush3.bf16.msra.mxu0 %v4255_v4  ;;  %v3381_v15 = vpop.f32.mrb[36].mxu1 }
 0x1ee   : > { %3925 = vmatprep.subr.bf16.mxu0 %v4256_v14  ;;  %v3382_v16 = vpop.f32.mrb[37].mxu1 }
 0x1ef   : > { %v5195_v20 = vadd.f32 %v3382_v16, %v3381_v15  ;;  %v3384_v3 = vpop.f32.mrb[38].mxu1 }
 0x1f0   : > { %v3385_v18 = vpop.f32.mrb[39].mxu1 }
 0x1f1   : > { %3926 = vmatpush3.bf16.msra.mxu0 %v4256_v14  ;;  %v5197_v58 = vadd.f32 %v3385_v18, %v3384_v3 }
 0x1f3   : > { %2723 = vmatmul.mubr.bf16.gmra.mrb[144].mxu1 %v5033_v59  ;;  %v5212_v59 = vld [vmem:[#allocation2 + $0x118] sm:$0xff] }
 0x1f4   : > { %3896 = vmatmul.mubr.bf16.gmra.mrb[16].mxu0 %v5200_v23  ;;  %2730 = vmatprep.mubr.bf16.mxu1 %v5048_v61  ;;  %v5216_v61 = vld [vmem:[#allocation2 + $0x130] sm:$0xff] }
 0x1f5   : > { %3899 = vmatprep.mubr.bf16.mxu0 %v5204_v19 }
 0x1f6   : > { %v3387_v51 = vpop.f32.mrb[40].mxu1 }
 0x1f7   : > { %v3388_v28 = vpop.f32.mrb[41].mxu1 }
 0x1f8   : > { %v5207_v52 = vadd.f32 %v3388_v28, %v3387_v51  ;;  %v3390_v57 = vpop.f32.mrb[42].mxu1 }
 0x1f9   : > { %v3391_v17 = vpop.f32.mrb[43].mxu1 }
 0x1fa   : > { %v5209_v29 = vadd.f32 %v3391_v17, %v3390_v57 }
 0x1fb   : > { %2731 = vmatmul.mubr.bf16.gmra.mrb[148].mxu1 %v5070_v24  ;;  %v5225_v24 = vld [vmem:[#allocation2 + $0x160] sm:$0xff] }
 0x1fc   : > { %3900 = vmatmul.mubr.bf16.gmra.mrb[20].mxu0 %v5212_v59  ;;  %2738 = vmatprep.mubr.bf16.mxu1 %v5037_v60 }
 0x1fd   : > { %3903 = vmatprep.mubr.bf16.mxu0 %v5216_v61 }
 0x1fe   : > { %v3393_v33 = vpop.f32.mrb[44].mxu1 }
 0x1ff   : > { %v3394_v30 = vpop.f32.mrb[45].mxu1 }
 0x200   : > { %v5219_v25 = vadd.f32 %v3394_v30, %v3393_v33  ;;  %v3396_v31 = vpop.f32.mrb[46].mxu1 }
 0x201   : > { %v3397_v32 = vpop.f32.mrb[47].mxu1 }
 0x202   : > { %v5221_v41 = vadd.f32 %v3397_v32, %v3396_v31 }
 0x203   : > { %2739 = vmatmul.mubr.bf16.gmra.mrb[152].mxu1 %v5063_v22 }
 0x204   : > { %3904 = vmatmul.mubr.bf16.gmra.mrb[24].mxu0 %v5046_v46  ;;  %2746 = vmatprep.mubr.bf16.mxu1 %v5140_v35 }
 0x205   : > { %3907 = vmatprep.mubr.bf16.mxu0 %v5225_v24 }
 0x206   : > { %v3399_v60 = vpop.f32.mrb[48].mxu1 }
 0x207   : > { %v3400_v36 = vpop.f32.mrb[49].mxu1 }
 0x208   : > { %v5229_v39 = vadd.f32 %v3400_v36, %v3399_v60  ;;  %v3402_v42 = vpop.f32.mrb[50].mxu1 }
 0x209   : > { %v3403_v43 = vpop.f32.mrb[51].mxu1 }
 0x20a   : > { %v5231_v44 = vadd.f32 %v3403_v43, %v3402_v42 }
 0x20b   : > { %2747 = vmatmul.mubr.bf16.gmra.mrb[156].mxu1 %v5140_v35 }
 0x20c   : > { %3908 = vmatmul.mubr.bf16.gmra.mrb[28].mxu0 %v5074_v26 }
 0x20d   : > { %3927 = vmatprep.mubr.bf16.mxu0 %v5147_v53 }
 0x20e   : > { %v3405_v46 = vpop.f32.mrb[52].mxu1 }
 0x20f   : > { %v3406_v22 = vpop.f32.mrb[53].mxu1 }
 0x210   : > { %v5236_v45 = vadd.f32 %v3406_v22, %v3405_v46  ;;  %v3408_v48 = vpop.f32.mrb[54].mxu1 }
 0x211   : > { %v3409_v38 = vpop.f32.mrb[55].mxu1 }
 0x212   : > { %v5238_v49 = vadd.f32 %v3409_v38, %v3408_v48 }
 0x214   : > { %3928 = vmatmul.mubr.bf16.vlgmr.msra.gmra.mrb[0].mxu0 %v5158_v37 }
 0x215   : > { %3931 = vmatprep.mubr.bf16.mxu0 %v5161_v6 }
 0x216   : > { %v3411_v50 = vpop.f32.mrb[56].mxu1 }
 0x217   : > { %v3412_v47 = vpop.f32.mrb[57].mxu1 }
 0x218   : > { %v5242_v40 = vadd.f32 %v3412_v47, %v3411_v50  ;;  %v3414_v34 = vpop.f32.mrb[58].mxu1  ;;  %v2388_v50 = vld [vmem:[#allocation2 + $0x148] sm:$0xff] }
 0x219   : > { %v3415_v26 = vpop.f32.mrb[59].mxu1 }
 0x21a   : > { %v5244_v10 = vadd.f32 %v3415_v26, %v3414_v34 }
 0x21c   : > { %3932 = vmatmul.mubr.bf16.gmra.mrb[4].mxu0 %v5170_v0 }
 0x21d   : > { %3935 = vmatprep.mubr.bf16.mxu0 %v5174_v1 }
 0x21e   : > { %v3417_v27 = vpop.f32.mrb[60].mxu1 }
 0x21f   : > { %v3418_v53 = vpop.f32.mrb[61].mxu1 }
 0x220   : > { %v5248_v8 = vadd.f32 %v3418_v53, %v3417_v27  ;;  %v3420_v54 = vpop.f32.mrb[62].mxu1 }
 0x221   : > { %v3421_v37 = vpop.f32.mrb[63].mxu1 }
 0x222   : > { %v5250_v56 = vadd.f32 %v3421_v37, %v3420_v54 }
 0x224   : > { %3936 = vmatmul.mubr.bf16.gmra.mrb[8].mxu0 %v5188_v13 }
 0x225   : > { %3939 = vmatprep.mubr.bf16.mxu0 %v5192_v55 }
 0x226   : > { %v3423_v6 = vpop.f32.mrb[64].mxu1 }
 0x227   : > { %v3424_v62 = vpop.f32.mrb[65].mxu1  ;;  %v3511_v63 = vpop.f32.mrb[32].mxu0 }
 0x228   : > { %v5254_v12 = vadd.f32 %v3424_v62, %v3423_v6  ;;  %v3426_v0 = vpop.f32.mrb[66].mxu1  ;;  %v3512_v2 = vpop.f32.mrb[33].mxu0 }
 0x229   : > { %v3513_v1 = vadd.f32 %v3512_v2, %v3511_v63  ;;  %v3427_v4 = vpop.f32.mrb[67].mxu1  ;;  %v3514_v5 = vpop.f32.mrb[34].mxu0  ;;  %v2394_v2 = vld [vmem:[#allocation2 + $0x178] sm:$0xff] }
 0x22a   : > { %v5256_v7 = vadd.f32 %v3427_v4, %v3426_v0  ;;  %v3515_v9 = vpop.f32.mrb[35].mxu0 }
 0x22b   : > { %v5259_v14 = vadd.f32 %v3513_v1, %v5180_v21  ;;  %v3516_v15 = vadd.f32 %v3515_v9, %v3514_v5 }
 0x22c   : > { %3940 = vmatmul.mubr.bf16.gmra.mrb[12].mxu0 %v5200_v23 }
 0x22d   : > { %v5263_v13 = vadd.f32 %v3516_v15, %v5182_v11  ;;  %3943 = vmatprep.mubr.bf16.mxu0 %v5204_v19 }
 0x22e   : > { %v3429_v55 = vpop.f32.mrb[68].mxu1 }
 0x22f   : > { %v3430_v16 = vpop.f32.mrb[69].mxu1  ;;  %v3517_v3 = vpop.f32.mrb[36].mxu0 }
 0x230   : > { %v5266_v18 = vadd.f32 %v3430_v16, %v3429_v55  ;;  %v3432_v51 = vpop.f32.mrb[70].mxu1  ;;  %v3518_v28 = vpop.f32.mrb[37].mxu0 }
 0x231   : > { %v3519_v57 = vadd.f32 %v3518_v28, %v3517_v3  ;;  %v3433_v17 = vpop.f32.mrb[71].mxu1  ;;  %v3520_v33 = vpop.f32.mrb[38].mxu0 }
 0x232   : > { %v5268_v21 = vadd.f32 %v3433_v17, %v3432_v51  ;;  %v3521_v30 = vpop.f32.mrb[39].mxu0 }
 0x233   : > { %v5271_v23 = vadd.f32 %v3519_v57, %v5195_v20  ;;  %v3522_v11 = vadd.f32 %v3521_v30, %v3520_v33 }
 0x234   : > { %3944 = vmatmul.mubr.bf16.gmra.mrb[16].mxu0 %v5212_v59 }
 0x235   : > { %v5275_v19 = vadd.f32 %v3522_v11, %v5197_v58  ;;  %3947 = vmatprep.mubr.bf16.mxu0 %v5216_v61 }
 0x236   : > { %v3435_v31 = vpop.f32.mrb[72].mxu1 }
 0x237   : > { %v3436_v32 = vpop.f32.mrb[73].mxu1  ;;  %v3523_v60 = vpop.f32.mrb[40].mxu0 }
 0x238   : > { %v5278_v36 = vadd.f32 %v3436_v32, %v3435_v31  ;;  %v3438_v42 = vpop.f32.mrb[74].mxu1  ;;  %v3524_v43 = vpop.f32.mrb[41].mxu0 }
 0x239   : > { %v3525_v46 = vadd.f32 %v3524_v43, %v3523_v60  ;;  %v3439_v22 = vpop.f32.mrb[75].mxu1  ;;  %v3526_v48 = vpop.f32.mrb[42].mxu0 }
 0x23a   : > { %v5280_v20 = vadd.f32 %v3439_v22, %v3438_v42  ;;  %v3527_v38 = vpop.f32.mrb[43].mxu0 }
 0x23b   : > { %v5283_v59 = vadd.f32 %v3525_v46, %v5207_v52  ;;  %v3528_v58 = vadd.f32 %v3527_v38, %v3526_v48 }
 0x23c   : > { %3948 = vmatmul.mubr.bf16.gmra.mrb[20].mxu0 %v2388_v50 }
 0x23d   : > { %v5286_v61 = vadd.f32 %v3528_v58, %v5209_v29  ;;  %3951 = vmatprep.mubr.bf16.mxu0 %v5225_v24  ;;  %v2397_v24 = vld [vmem:[#allocation2 + $0x190] sm:$0xff] }
 0x23e   : > { %v3441_v47 = vpop.f32.mrb[76].mxu1 }
 0x23f   : > { %v3442_v34 = vpop.f32.mrb[77].mxu1  ;;  %v3529_v26 = vpop.f32.mrb[44].mxu0 }
 0x240   : > { %v5289_v27 = vadd.f32 %v3442_v34, %v3441_v47  ;;  %v3444_v53 = vpop.f32.mrb[78].mxu1  ;;  %v3530_v54 = vpop.f32.mrb[45].mxu0 }
 0x241   : > { %v3531_v37 = vadd.f32 %v3530_v54, %v3529_v26  ;;  %v3445_v6 = vpop.f32.mrb[79].mxu1  ;;  %v3532_v62 = vpop.f32.mrb[46].mxu0 }
 0x242   : > { %v5291_v52 = vadd.f32 %v3445_v6, %v3444_v53  ;;  %v3533_v63 = vpop.f32.mrb[47].mxu0 }
 0x243   : > { %v5294_v0 = vadd.f32 %v3531_v37, %v5219_v25  ;;  %v3534_v29 = vadd.f32 %v3533_v63, %v3532_v62 }
 0x244   : > { %3952 = vmatmul.mubr.bf16.gmra.mrb[24].mxu0 %v2394_v2 }
 0x245   : > { %v5297_v1 = vadd.f32 %v3534_v29, %v5221_v41  ;;  %3955 = vmatprep.mubr.bf16.mxu0 %v2397_v24 }
 0x246   : > { %v3447_v4 = vpop.f32.mrb[80].mxu1 }
 0x247   : > { %v3448_v5 = vpop.f32.mrb[81].mxu1  ;;  %v3535_v9 = vpop.f32.mrb[48].mxu0 }
 0x248   : > { %v5299_v15 = vadd.f32 %v3448_v5, %v3447_v4  ;;  %v3450_v55 = vpop.f32.mrb[82].mxu1  ;;  %v3536_v16 = vpop.f32.mrb[49].mxu0 }
 0x249   : > { %v3537_v3 = vadd.f32 %v3536_v16, %v3535_v9  ;;  %v3451_v51 = vpop.f32.mrb[83].mxu1  ;;  %v3538_v28 = vpop.f32.mrb[50].mxu0 }
 0x24a   : > { %v5301_v25 = vadd.f32 %v3451_v51, %v3450_v55  ;;  %v3539_v57 = vpop.f32.mrb[51].mxu0 }
 0x24b   : > { %v5304_v17 = vadd.f32 %v3537_v3, %v5229_v39  ;;  %v3540_v33 = vadd.f32 %v3539_v57, %v3538_v28 }
 0x24c   : > { %3956 = vmatmul.mubr.bf16.gmra.mrb[28].mxu0 %v5140_v35 }
 0x24d   : > { %v5308_v41 = vadd.f32 %v3540_v33, %v5231_v44 }
 0x24e   : > { %v3453_v30 = vpop.f32.mrb[84].mxu1 }
 0x24f   : > { %v3454_v11 = vpop.f32.mrb[85].mxu1  ;;  %v3541_v31 = vpop.f32.mrb[52].mxu0 }
 0x250   : > { %v5310_v32 = vadd.f32 %v3454_v11, %v3453_v30  ;;  %v3456_v60 = vpop.f32.mrb[86].mxu1  ;;  %v3542_v42 = vpop.f32.mrb[53].mxu0 }
 0x251   : > { %v3543_v43 = vadd.f32 %v3542_v42, %v3541_v31  ;;  %v3457_v46 = vpop.f32.mrb[87].mxu1  ;;  %v3544_v22 = vpop.f32.mrb[54].mxu0 }
 0x252   : > { %v5312_v48 = vadd.f32 %v3457_v46, %v3456_v60  ;;  %v3545_v39 = vpop.f32.mrb[55].mxu0 }
 0x253   : > { %v5315_v38 = vadd.f32 %v3543_v43, %v5236_v45  ;;  %v3546_v35 = vadd.f32 %v3545_v39, %v3544_v22 }
 0x255   : > { %v5318_v44 = vadd.f32 %v3546_v35, %v5238_v49 }
 0x256   : > { %v3459_v58 = vpop.f32.mrb[88].mxu1 }
 0x257   : > { %v3460_v50 = vpop.f32.mrb[89].mxu1  ;;  %v3547_v47 = vpop.f32.mrb[56].mxu0 }
 0x258   : > { %v5320_v34 = vadd.f32 %v3460_v50, %v3459_v58  ;;  %v3462_v26 = vpop.f32.mrb[90].mxu1  ;;  %v3548_v53 = vpop.f32.mrb[57].mxu0 }
 0x259   : > { %v3549_v54 = vadd.f32 %v3548_v53, %v3547_v47  ;;  %v3463_v37 = vpop.f32.mrb[91].mxu1  ;;  %v3550_v6 = vpop.f32.mrb[58].mxu0 }
 0x25a   : > { %v5322_v62 = vadd.f32 %v3463_v37, %v3462_v26  ;;  %v3551_v63 = vpop.f32.mrb[59].mxu0 }
 0x25b   : > { %v5325_v45 = vadd.f32 %v3549_v54, %v5242_v40  ;;  %v3552_v29 = vadd.f32 %v3551_v63, %v3550_v6 }
 0x25d   : > { %v5328_v49 = vadd.f32 %v3552_v29, %v5244_v10 }
 0x25e   : > { %v3465_v2 = vpop.f32.mrb[92].mxu1 }
 0x25f   : > { %v3466_v24 = vpop.f32.mrb[93].mxu1  ;;  %v3553_v4 = vpop.f32.mrb[60].mxu0 }
 0x260   : > { %v5330_v5 = vadd.f32 %v3466_v24, %v3465_v2  ;;  %v3468_v9 = vpop.f32.mrb[94].mxu1  ;;  %v3554_v55 = vpop.f32.mrb[61].mxu0 }
 0x261   : > { %v3555_v16 = vadd.f32 %v3554_v55, %v3553_v4  ;;  %v3469_v3 = vpop.f32.mrb[95].mxu1  ;;  %v3556_v51 = vpop.f32.mrb[62].mxu0 }
 0x262   : > { %v5332_v28 = vadd.f32 %v3469_v3, %v3468_v9  ;;  %v3557_v57 = vpop.f32.mrb[63].mxu0 }
 0x263   : > { %v5335_v40 = vadd.f32 %v3555_v16, %v5248_v8  ;;  %v3558_v33 = vadd.f32 %v3557_v57, %v3556_v51 }
 0x265   : > { %v5338_v10 = vadd.f32 %v3558_v33, %v5250_v56 }
 0x266   : > { %v3647_v30 = vpop.f32.mrb[96].mxu1 }
 0x267   : > { %v3559_v11 = vpop.f32.mrb[64].mxu0  ;;  %v3648_v31 = vpop.f32.mrb[97].mxu1 }
 0x268   : > { %v3649_v60 = vadd.f32 %v3648_v31, %v3647_v30  ;;  %v3560_v42 = vpop.f32.mrb[65].mxu0  ;;  %v3650_v43 = vpop.f32.mrb[98].mxu1 }
 0x269   : > { %v3561_v46 = vadd.f32 %v3560_v42, %v3559_v11  ;;  %v3562_v22 = vpop.f32.mrb[66].mxu0  ;;  %v3651_v39 = vpop.f32.mrb[99].mxu1 }
 0x26a   : > { %v3652_v35 = vadd.f32 %v3651_v39, %v3650_v43  ;;  %v3563_v58 = vpop.f32.mrb[67].mxu0  ;;  %v5341_v50 = vadd.f32 %v5259_v14, %v3649_v60 }
 0x26b   : > { %v5344_v8 = vadd.f32 %v3561_v46, %v5254_v12  ;;  %v3564_v47 = vadd.f32 %v3563_v58, %v3562_v22 }
 0x26c   : > { %v5347_v56 = vadd.f32 %v5263_v13, %v3652_v35 }
 0x26d   : > { %v5350_v26 = vadd.f32 %v3564_v47, %v5256_v7 }
 0x26e   : > { %v3653_v53 = vpop.f32.mrb[100].mxu1 }
 0x26f   : > { %v3565_v54 = vpop.f32.mrb[68].mxu0  ;;  %v3654_v37 = vpop.f32.mrb[101].mxu1 }
 0x270   : > { %v3655_v6 = vadd.f32 %v3654_v37, %v3653_v53  ;;  %v3566_v63 = vpop.f32.mrb[69].mxu0  ;;  %v3656_v29 = vpop.f32.mrb[102].mxu1 }
 0x271   : > { %v3567_v2 = vadd.f32 %v3566_v63, %v3565_v54  ;;  %v3568_v24 = vpop.f32.mrb[70].mxu0  ;;  %v3657_v14 = vpop.f32.mrb[103].mxu1 }
 0x272   : > { %v3658_v4 = vadd.f32 %v3657_v14, %v3656_v29  ;;  %v3569_v9 = vpop.f32.mrb[71].mxu0  ;;  %v5353_v12 = vadd.f32 %v5271_v23, %v3655_v6 }
 0x273   : > { %v5356_v13 = vadd.f32 %v3567_v2, %v5266_v18  ;;  %v3570_v55 = vadd.f32 %v3569_v9, %v3568_v24 }
 0x274   : > { %v5359_v7 = vadd.f32 %v5275_v19, %v3658_v4 }
 0x275   : > { %v5362_v16 = vadd.f32 %v3570_v55, %v5268_v21 }
 0x276   : > { %v3659_v3 = vpop.f32.mrb[104].mxu1 }
 0x277   : > { %v3571_v51 = vpop.f32.mrb[72].mxu0  ;;  %v3660_v57 = vpop.f32.mrb[105].mxu1 }
 0x278   : > { %v3661_v33 = vadd.f32 %v3660_v57, %v3659_v3  ;;  %v3572_v30 = vpop.f32.mrb[73].mxu0  ;;  %v3662_v11 = vpop.f32.mrb[106].mxu1 }
 0x279   : > { %v3573_v31 = vadd.f32 %v3572_v30, %v3571_v51  ;;  %v3574_v60 = vpop.f32.mrb[74].mxu0  ;;  %v3663_v23 = vpop.f32.mrb[107].mxu1 }
 0x27a   : > { %v3664_v42 = vadd.f32 %v3663_v23, %v3662_v11  ;;  %v3575_v43 = vpop.f32.mrb[75].mxu0  ;;  %v5365_v18 = vadd.f32 %v5283_v59, %v3661_v33 }
 0x27b   : > { %v5368_v19 = vadd.f32 %v3573_v31, %v5278_v36  ;;  %v3576_v46 = vadd.f32 %v3575_v43, %v3574_v60 }
 0x27c   : > { %v5371_v21 = vadd.f32 %v5286_v61, %v3664_v42 }
 0x27d   : > { %v5374_v22 = vadd.f32 %v3576_v46, %v5280_v20 }
 0x27e   : > { %v3665_v39 = vpop.f32.mrb[108].mxu1 }
 0x27f   : > { %v3577_v35 = vpop.f32.mrb[76].mxu0  ;;  %v3666_v58 = vpop.f32.mrb[109].mxu1 }
 0x280   : > { %v3667_v47 = vadd.f32 %v3666_v58, %v3665_v39  ;;  %v3578_v53 = vpop.f32.mrb[77].mxu0  ;;  %v3668_v54 = vpop.f32.mrb[110].mxu1 }
 0x281   : > { %v3579_v37 = vadd.f32 %v3578_v53, %v3577_v35  ;;  %v3580_v6 = vpop.f32.mrb[78].mxu0  ;;  %v3669_v59 = vpop.f32.mrb[111].mxu1 }
 0x282   : > { %v3670_v63 = vadd.f32 %v3669_v59, %v3668_v54  ;;  %v3581_v29 = vpop.f32.mrb[79].mxu0  ;;  %v5377_v36 = vadd.f32 %v5294_v0, %v3667_v47 }
 0x283   : > { %v5380_v61 = vadd.f32 %v3579_v37, %v5289_v27  ;;  %v3582_v2 = vadd.f32 %v3581_v29, %v3580_v6 }
 0x284   : > { %v5383_v20 = vadd.f32 %v5297_v1, %v3670_v63 }
 0x285   : > { %v5386_v24 = vadd.f32 %v3582_v2, %v5291_v52 }
 0x286   : > { %v3671_v14 = vpop.f32.mrb[112].mxu1 }
 0x287   : > { %v3583_v4 = vpop.f32.mrb[80].mxu0  ;;  %v3672_v9 = vpop.f32.mrb[113].mxu1 }
 0x288   : > { %v3673_v55 = vadd.f32 %v3672_v9, %v3671_v14  ;;  %v3584_v3 = vpop.f32.mrb[81].mxu0  ;;  %v3674_v51 = vpop.f32.mrb[114].mxu1 }
 0x289   : > { %v3585_v57 = vadd.f32 %v3584_v3, %v3583_v4  ;;  %v3586_v33 = vpop.f32.mrb[82].mxu0  ;;  %v3675_v0 = vpop.f32.mrb[115].mxu1 }
 0x28a   : > { %v3676_v30 = vadd.f32 %v3675_v0, %v3674_v51  ;;  %v3587_v11 = vpop.f32.mrb[83].mxu0  ;;  %v5389_v27 = vadd.f32 %v5304_v17, %v3673_v55 }
 0x28b   : > { %v5392_v1 = vadd.f32 %v3585_v57, %v5299_v15  ;;  %v3588_v31 = vadd.f32 %v3587_v11, %v3586_v33 }
 0x28c   : > { %v5395_v52 = vadd.f32 %v5308_v41, %v3676_v30 }
 0x28d   : > { %v5398_v60 = vadd.f32 %v3588_v31, %v5301_v25 }
 0x28e   : > { %v3677_v23 = vpop.f32.mrb[116].mxu1 }
 0x28f   : > { %v3589_v42 = vpop.f32.mrb[84].mxu0  ;;  %v3678_v43 = vpop.f32.mrb[117].mxu1 }
 0x290   : > { %v3679_v46 = vadd.f32 %v3678_v43, %v3677_v23  ;;  %v3590_v39 = vpop.f32.mrb[85].mxu0  ;;  %v3680_v35 = vpop.f32.mrb[118].mxu1 }
 0x291   : > { %v3591_v58 = vadd.f32 %v3590_v39, %v3589_v42  ;;  %v3592_v47 = vpop.f32.mrb[86].mxu0  ;;  %v3681_v17 = vpop.f32.mrb[119].mxu1 }
 0x292   : > { %v3682_v53 = vadd.f32 %v3681_v17, %v3680_v35  ;;  %v3593_v54 = vpop.f32.mrb[87].mxu0  ;;  %v5401_v15 = vadd.f32 %v5315_v38, %v3679_v46 }
 0x293   : > { %v5404_v41 = vadd.f32 %v3591_v58, %v5310_v32  ;;  %v3594_v37 = vadd.f32 %v3593_v54, %v3592_v47 }
 0x294   : > { %v5407_v25 = vadd.f32 %v5318_v44, %v3682_v53 }
 0x295   : > { %v5410_v6 = vadd.f32 %v3594_v37, %v5312_v48 }
 0x296   : > { %v3683_v59 = vpop.f32.mrb[120].mxu1 }
 0x297   : > { %v3595_v63 = vpop.f32.mrb[88].mxu0  ;;  %v3684_v29 = vpop.f32.mrb[121].mxu1 }
 0x298   : > { %v3685_v2 = vadd.f32 %v3684_v29, %v3683_v59  ;;  %v3596_v14 = vpop.f32.mrb[89].mxu0  ;;  %v3686_v4 = vpop.f32.mrb[122].mxu1 }
 0x299   : > { %v3597_v9 = vadd.f32 %v3596_v14, %v3595_v63  ;;  %v3598_v55 = vpop.f32.mrb[90].mxu0  ;;  %v3687_v38 = vpop.f32.mrb[123].mxu1 }
 0x29a   : > { %v3688_v3 = vadd.f32 %v3687_v38, %v3686_v4  ;;  %v3599_v51 = vpop.f32.mrb[91].mxu0  ;;  %v5413_v32 = vadd.f32 %v5325_v45, %v3685_v2 }
 0x29b   : > { %v5416_v44 = vadd.f32 %v3597_v9, %v5320_v34  ;;  %v3600_v57 = vadd.f32 %v3599_v51, %v3598_v55 }
 0x29c   : > { %v5419_v48 = vadd.f32 %v5328_v49, %v3688_v3 }
 0x29d   : > { %v5422_v33 = vadd.f32 %v3600_v57, %v5322_v62 }
 0x29e   : > { %v3689_v0 = vpop.f32.mrb[124].mxu1 }
 0x29f   : > { %v3601_v30 = vpop.f32.mrb[92].mxu0  ;;  %v3690_v11 = vpop.f32.mrb[125].mxu1 }
 0x2a0   : > { %v3691_v31 = vadd.f32 %v3690_v11, %v3689_v0  ;;  %v3602_v23 = vpop.f32.mrb[93].mxu0  ;;  %v3692_v42 = vpop.f32.mrb[126].mxu1 }
 0x2a1   : > { %v3603_v43 = vadd.f32 %v3602_v23, %v3601_v30  ;;  %v3604_v46 = vpop.f32.mrb[94].mxu0  ;;  %v3693_v45 = vpop.f32.mrb[127].mxu1 }
 0x2a2   : > { %v3694_v39 = vadd.f32 %v3693_v45, %v3692_v42  ;;  %v3605_v35 = vpop.f32.mrb[95].mxu0  ;;  %v5425_v34 = vadd.f32 %v5335_v40, %v3691_v31 }
 0x2a3   : > { %v5428_v49 = vadd.f32 %v3603_v43, %v5330_v5  ;;  %v3606_v58 = vadd.f32 %v3605_v35, %v3604_v46 }
 0x2a4   : > { %v5431_v62 = vadd.f32 %v5338_v10, %v3694_v39 }
 0x2a5   : > { %v5434_v47 = vadd.f32 %v3606_v58, %v5332_v28 }
 0x2a6   : > { %v3695_v17 = vpop.f32.mrb[128].mxu1 }
 0x2a7   : > { %v3696_v53 = vpop.f32.mrb[129].mxu1 }
 0x2a8   : > { %v3697_v54 = vadd.f32 %v3696_v53, %v3695_v17  ;;  %v3698_v37 = vpop.f32.mrb[130].mxu1 }
 0x2a9   : > { %v3699_v59 = vpop.f32.mrb[131].mxu1 }
 0x2aa   : > { %v3700_v63 = vadd.f32 %v3699_v59, %v3698_v37  ;;  %v5437_v29 = vadd.f32 %v5344_v8, %v3697_v54 }
 0x2ac   : > { %v5440_v40 = vadd.f32 %v5350_v26, %v3700_v63 }
 0x2ae   : > { %v3701_v5 = vpop.f32.mrb[132].mxu1 }
 0x2af   : > { %v3702_v2 = vpop.f32.mrb[133].mxu1 }
 0x2b0   : > { %v3703_v14 = vadd.f32 %v3702_v2, %v3701_v5  ;;  %v3704_v10 = vpop.f32.mrb[134].mxu1 }
 0x2b1   : > { %v3705_v4 = vpop.f32.mrb[135].mxu1 }
 0x2b2   : > { %v3706_v9 = vadd.f32 %v3705_v4, %v3704_v10  ;;  %v5443_v28 = vadd.f32 %v5356_v13, %v3703_v14 }
 0x2b4   : > { %v5446_v55 = vadd.f32 %v5362_v16, %v3706_v9 }
 0x2b6   : > { %v3707_v38 = vpop.f32.mrb[136].mxu1 }
 0x2b7   : > { %v3708_v3 = vpop.f32.mrb[137].mxu1 }
 0x2b8   : > { %v3709_v51 = vadd.f32 %v3708_v3, %v3707_v38  ;;  %v3710_v8 = vpop.f32.mrb[138].mxu1 }
 0x2b9   : > { %v3711_v57 = vpop.f32.mrb[139].mxu1 }
 0x2ba   : > { %v3712_v0 = vadd.f32 %v3711_v57, %v3710_v8  ;;  %v5449_v26 = vadd.f32 %v5368_v19, %v3709_v51 }
 0x2bc   : > { %v5452_v30 = vadd.f32 %v5374_v22, %v3712_v0 }
 0x2be   : > { %v3713_v11 = vpop.f32.mrb[140].mxu1 }
 0x2bf   : > { %v3714_v31 = vpop.f32.mrb[141].mxu1 }
 0x2c0   : > { %v3715_v23 = vadd.f32 %v3714_v31, %v3713_v11  ;;  %v3716_v13 = vpop.f32.mrb[142].mxu1 }
 0x2c1   : > { %v3717_v42 = vpop.f32.mrb[143].mxu1 }
 0x2c2   : > { %v3718_v43 = vadd.f32 %v3717_v42, %v3716_v13  ;;  %v5455_v16 = vadd.f32 %v5380_v61, %v3715_v23 }
 0x2c4   : > { %v5458_v46 = vadd.f32 %v5386_v24, %v3718_v43 }
 0x2c6   : > { %v3719_v45 = vpop.f32.mrb[144].mxu1 }
 0x2c7   : > { %v3720_v39 = vpop.f32.mrb[145].mxu1 }
 0x2c8   : > { %v3721_v35 = vadd.f32 %v3720_v39, %v3719_v45  ;;  %v3722_v19 = vpop.f32.mrb[146].mxu1 }
 0x2c9   : > { %v3723_v58 = vpop.f32.mrb[147].mxu1 }
 0x2ca   : > { %v3724_v17 = vadd.f32 %v3723_v58, %v3722_v19  ;;  %v5461_v22 = vadd.f32 %v5392_v1, %v3721_v35 }
 0x2cc   : > { %v5464_v53 = vadd.f32 %v5398_v60, %v3724_v17 }
 0x2ce   : > { %v3725_v54 = vpop.f32.mrb[148].mxu1 }
 0x2cf   : > { %v3726_v37 = vpop.f32.mrb[149].mxu1 }
 0x2d0   : > { %v3727_v59 = vadd.f32 %v3726_v37, %v3725_v54  ;;  %v3728_v61 = vpop.f32.mrb[150].mxu1 }
 0x2d1   : > { %v3729_v63 = vpop.f32.mrb[151].mxu1 }
 0x2d2   : > { %v3730_v5 = vadd.f32 %v3729_v63, %v3728_v61  ;;  %v5467_v24 = vadd.f32 %v5404_v41, %v3727_v59 }
 0x2d4   : > { %v5470_v2 = vadd.f32 %v5410_v6, %v3730_v5 }
 0x2d6   : > { %v3731_v14 = vpop.f32.mrb[152].mxu1 }
 0x2d7   : > { %v3732_v10 = vpop.f32.mrb[153].mxu1 }
 0x2d8   : > { %v3733_v1 = vadd.f32 %v3732_v10, %v3731_v14  ;;  %v3734_v4 = vpop.f32.mrb[154].mxu1 }
 0x2d9   : > { %v3735_v60 = vpop.f32.mrb[155].mxu1 }
 0x2da   : > { %v3736_v9 = vadd.f32 %v3735_v60, %v3734_v4  ;;  %v5473_v38 = vadd.f32 %v5416_v44, %v3733_v1  ;;  %v5488_v44 = vld [vmem:[%s5646_s4] ss:$0 sm:$0xff] }
 0x2dc   : > { %v5476_v3 = vadd.f32 %v5422_v33, %v3736_v9 }
 0x2de   : > { %v3737_v51 = vpop.f32.mrb[156].mxu1 }
 0x2df   : > { %v3738_v41 = vpop.f32.mrb[157].mxu1 }
 0x2e0   : > { %v3739_v8 = vadd.f32 %v3738_v41, %v3737_v51  ;;  %v3740_v57 = vpop.f32.mrb[158].mxu1 }
 0x2e1   : > { %v3741_v6 = vpop.f32.mrb[159].mxu1 }
 0x2e2   : > { %v3742_v0 = vadd.f32 %v3741_v6, %v3740_v57  ;;  %v5479_v11 = vadd.f32 %v5428_v49, %v3739_v8 }
 0x2e4   : > { %v5482_v31 = vadd.f32 %v5434_v47, %v3742_v0 }
 0x2e7   : > { %v3929_v23 = vpop.f32.mrb[0].mxu0 }
 0x2e8   : > { %v3961_v33 = vadd.f32 %v5353_v12, %v3929_v23  ;;  %v2789_v13 = vpop.f32.mrb[1].mxu0 }
 0x2e9   : > { %v3964_v42 = vadd.f32 %v5341_v50, %v2789_v13  ;;  %v3930_v43 = vpop.f32.mrb[2].mxu0 }
 0x2ea   : > { %v2957_v49 = vadd.f32 %v3961_v33, %v5488_v44  ;;  %v3967_v47 = vadd.f32 %v5359_v7, %v3930_v43  ;;  %v2792_v45 = vpop.f32.mrb[3].mxu0 }
 0x2eb   : > { %v2955_v39 = vadd.f32 %v3964_v42, %v5488_v44  ;;  %v3970_v35 = vadd.f32 %v5347_v56, %v2792_v45 }
 0x2ec   : > { %v2989_v19 = vmax.f32 %v2957_v49, 0.0  ;;  %v2958_v58 = vadd.f32 %v3967_v47, %v5488_v44 }
 0x2ed   : > { %v2987_v17 = vmax.f32 %v2955_v39, 0.0  ;;  %v2956_v54 = vadd.f32 %v3970_v35, %v5488_v44 }
 0x2ee   : > { %3021 = vst [vmem:[%s5500_s17 + $0x10] sm:$0xff] %v2989_v19  ;;  %v2990_v50 = vmax.f32 %v2958_v58, 0.0 }
 0x2ef   : > { %3019 = vst [vmem:[%s5500_s17] sm:$0xff] %v2987_v17  ;;  %v2988_v12 = vmax.f32 %v2956_v54, 0.0  ;;  %v3933_v7 = vpop.f32.mrb[4].mxu0 }
 0x2f0   : > { %3022 = vst [vmem:[%s5500_s17 + $0x18] sm:$0xff] %v2990_v50  ;;  %v3973_v56 = vadd.f32 %v5377_v36, %v3933_v7  ;;  %v2805_v37 = vpop.f32.mrb[5].mxu0 }
 0x2f1   : > { %3020 = vst [vmem:[%s5500_s17 + $0x8] sm:$0xff] %v2988_v12  ;;  %v3976_v59 = vadd.f32 %v5365_v18, %v2805_v37  ;;  %v3934_v61 = vpop.f32.mrb[6].mxu0 }
 0x2f2   : > { %v2961_v63 = vadd.f32 %v3973_v56, %v5488_v44  ;;  %v3979_v5 = vadd.f32 %v5383_v20, %v3934_v61  ;;  %v2808_v14 = vpop.f32.mrb[7].mxu0 }
 0x2f3   : > { %v2959_v10 = vadd.f32 %v3976_v59, %v5488_v44  ;;  %v3982_v1 = vadd.f32 %v5371_v21, %v2808_v14 }
 0x2f4   : > { %v2993_v4 = vmax.f32 %v2961_v63, 0.0  ;;  %v2962_v36 = vadd.f32 %v3979_v5, %v5488_v44 }
 0x2f5   : > { %v2991_v60 = vmax.f32 %v2959_v10, 0.0  ;;  %v2960_v9 = vadd.f32 %v3982_v1, %v5488_v44 }
 0x2f6   : > { %3025 = vst [vmem:[%s5500_s17 + $0x30] sm:$0xff] %v2993_v4  ;;  %v2994_v18 = vmax.f32 %v2962_v36, 0.0 }
 0x2f7   : > { %3023 = vst [vmem:[%s5500_s17 + $0x20] sm:$0xff] %v2991_v60  ;;  %v2992_v51 = vmax.f32 %v2960_v9, 0.0  ;;  %v3937_v41 = vpop.f32.mrb[8].mxu0 }
 0x2f8   : > { %3026 = vst [vmem:[%s5500_s17 + $0x38] sm:$0xff] %v2994_v18  ;;  %v3985_v20 = vadd.f32 %v5401_v15, %v3937_v41  ;;  %v2821_v8 = vpop.f32.mrb[9].mxu0 }
 0x2f9   : > { %3024 = vst [vmem:[%s5500_s17 + $0x28] sm:$0xff] %v2992_v51  ;;  %v3988_v21 = vadd.f32 %v5389_v27, %v2821_v8  ;;  %v3938_v57 = vpop.f32.mrb[10].mxu0 }
 0x2fa   : > { %v2965_v6 = vadd.f32 %v3985_v20, %v5488_v44  ;;  %v3991_v0 = vadd.f32 %v5407_v25, %v3938_v57  ;;  %v2824_v23 = vpop.f32.mrb[11].mxu0 }
 0x2fb   : > { %v2963_v33 = vadd.f32 %v3988_v21, %v5488_v44  ;;  %v3994_v13 = vadd.f32 %v5395_v52, %v2824_v23 }
 0x2fc   : > { %v2997_v42 = vmax.f32 %v2965_v6, 0.0  ;;  %v2966_v15 = vadd.f32 %v3991_v0, %v5488_v44 }
 0x2fd   : > { %v2995_v43 = vmax.f32 %v2963_v33, 0.0  ;;  %v2964_v49 = vadd.f32 %v3994_v13, %v5488_v44 }
 0x2fe   : > { %3029 = vst [vmem:[%s5500_s17 + $0x50] sm:$0xff] %v2997_v42  ;;  %v2998_v27 = vmax.f32 %v2966_v15, 0.0 }
 0x2ff   : > { %3027 = vst [vmem:[%s5500_s17 + $0x40] sm:$0xff] %v2995_v43  ;;  %v2996_v47 = vmax.f32 %v2964_v49, 0.0  ;;  %v3941_v45 = vpop.f32.mrb[12].mxu0 }
 0x300   : > { %3030 = vst [vmem:[%s5500_s17 + $0x58] sm:$0xff] %v2998_v27  ;;  %v3997_v25 = vadd.f32 %v5425_v34, %v3941_v45  ;;  %v2837_v39 = vpop.f32.mrb[13].mxu0 }
 0x301   : > { %3028 = vst [vmem:[%s5500_s17 + $0x48] sm:$0xff] %v2996_v47  ;;  %v4000_v52 = vadd.f32 %v5413_v32, %v2837_v39  ;;  %v3942_v35 = vpop.f32.mrb[14].mxu0 }
 0x302   : > { %v2969_v19 = vadd.f32 %v3997_v25, %v5488_v44  ;;  %v4003_v58 = vadd.f32 %v5431_v62, %v3942_v35  ;;  %v2840_v17 = vpop.f32.mrb[15].mxu0 }
 0x303   : > { %v2967_v54 = vadd.f32 %v4000_v52, %v5488_v44  ;;  %v4006_v50 = vadd.f32 %v5419_v48, %v2840_v17 }
 0x304   : > { %v3001_v12 = vmax.f32 %v2969_v19, 0.0  ;;  %v2970_v34 = vadd.f32 %v4003_v58, %v5488_v44 }
 0x305   : > { %v2999_v7 = vmax.f32 %v2967_v54, 0.0  ;;  %v2968_v56 = vadd.f32 %v4006_v50, %v5488_v44 }
 0x306   : > { %3033 = vst [vmem:[%s5500_s17 + $0x70] sm:$0xff] %v3001_v12  ;;  %v3002_v32 = vmax.f32 %v2970_v34, 0.0 }
 0x307   : > { %3031 = vst [vmem:[%s5500_s17 + $0x60] sm:$0xff] %v2999_v7  ;;  %v3000_v37 = vmax.f32 %v2968_v56, 0.0  ;;  %v3945_v59 = vpop.f32.mrb[16].mxu0 }
 0x308   : > { %3034 = vst [vmem:[%s5500_s17 + $0x78] sm:$0xff] %v3002_v32  ;;  %v4009_v62 = vadd.f32 %v5443_v28, %v3945_v59  ;;  %v2853_v61 = vpop.f32.mrb[17].mxu0 }
 0x309   : > { %3032 = vst [vmem:[%s5500_s17 + $0x68] sm:$0xff] %v3000_v37  ;;  %v4012_v48 = vadd.f32 %v5437_v29, %v2853_v61  ;;  %v3946_v63 = vpop.f32.mrb[18].mxu0 }
 0x30a   : > { %v2973_v5 = vadd.f32 %v4009_v62, %v5488_v44  ;;  %v4015_v14 = vadd.f32 %v5446_v55, %v3946_v63  ;;  %v2856_v10 = vpop.f32.mrb[19].mxu0 }
 0x30b   : > { %v2971_v1 = vadd.f32 %v4012_v48, %v5488_v44  ;;  %v4018_v4 = vadd.f32 %v5440_v40, %v2856_v10 }
 0x30c   : > { %v3005_v36 = vmax.f32 %v2973_v5, 0.0  ;;  %v2974_v28 = vadd.f32 %v4015_v14, %v5488_v44 }
 0x30d   : > { %v3003_v60 = vmax.f32 %v2971_v1, 0.0  ;;  %v2972_v9 = vadd.f32 %v4018_v4, %v5488_v44 }
 0x30e   : > { %3037 = vst [vmem:[%s5500_s17 + $0x90] sm:$0xff] %v3005_v36  ;;  %v3006_v29 = vmax.f32 %v2974_v28, 0.0 }
 0x30f   : > { %3035 = vst [vmem:[%s5500_s17 + $0x80] sm:$0xff] %v3003_v60  ;;  %v3004_v18 = vmax.f32 %v2972_v9, 0.0  ;;  %v3949_v51 = vpop.f32.mrb[20].mxu0 }
 0x310   : > { %3038 = vst [vmem:[%s5500_s17 + $0x98] sm:$0xff] %v3006_v29  ;;  %v4021_v55 = vadd.f32 %v5455_v16, %v3949_v51  ;;  %v2869_v41 = vpop.f32.mrb[21].mxu0 }
 0x311   : > { %3036 = vst [vmem:[%s5500_s17 + $0x88] sm:$0xff] %v3004_v18  ;;  %v4024_v40 = vadd.f32 %v5449_v26, %v2869_v41  ;;  %v3950_v20 = vpop.f32.mrb[22].mxu0 }
 0x312   : > { %v2977_v8 = vadd.f32 %v4021_v55, %v5488_v44  ;;  %v4027_v21 = vadd.f32 %v5458_v46, %v3950_v20  ;;  %v2872_v57 = vpop.f32.mrb[23].mxu0 }
 0x313   : > { %v2975_v6 = vadd.f32 %v4024_v40, %v5488_v44  ;;  %v4030_v0 = vadd.f32 %v5452_v30, %v2872_v57 }
 0x314   : > { %v3009_v23 = vmax.f32 %v2977_v8, 0.0  ;;  %v2978_v16 = vadd.f32 %v4027_v21, %v5488_v44 }
 0x315   : > { %v3007_v33 = vmax.f32 %v2975_v6, 0.0  ;;  %v2976_v13 = vadd.f32 %v4030_v0, %v5488_v44 }
 0x316   : > { %3041 = vst [vmem:[%s5500_s17 + $0xb0] sm:$0xff] %v3009_v23  ;;  %v3010_v26 = vmax.f32 %v2978_v16, 0.0 }
 0x317   : > { %3039 = vst [vmem:[%s5500_s17 + $0xa0] sm:$0xff] %v3007_v33  ;;  %v3008_v42 = vmax.f32 %v2976_v13, 0.0  ;;  %v3953_v15 = vpop.f32.mrb[24].mxu0 }
 0x318   : > { %3042 = vst [vmem:[%s5500_s17 + $0xb8] sm:$0xff] %v3010_v26  ;;  %v4033_v46 = vadd.f32 %v5467_v24, %v3953_v15  ;;  %v2885_v43 = vpop.f32.mrb[25].mxu0 }
 0x319   : > { %3040 = vst [vmem:[%s5500_s17 + $0xa8] sm:$0xff] %v3008_v42  ;;  %v4036_v30 = vadd.f32 %v5461_v22, %v2885_v43  ;;  %v3954_v49 = vpop.f32.mrb[26].mxu0 }
 0x31a   : > { %v2981_v27 = vadd.f32 %v4033_v46, %v5488_v44  ;;  %v4039_v47 = vadd.f32 %v5470_v2, %v3954_v49  ;;  %v2888_v45 = vpop.f32.mrb[27].mxu0 }
 0x31b   : > { %v2979_v25 = vadd.f32 %v4036_v30, %v5488_v44  ;;  %v4042_v39 = vadd.f32 %v5464_v53, %v2888_v45 }
 0x31c   : > { %v3013_v52 = vmax.f32 %v2981_v27, 0.0  ;;  %v2982_v24 = vadd.f32 %v4039_v47, %v5488_v44 }
 0x31d   : > { %v3011_v35 = vmax.f32 %v2979_v25, 0.0  ;;  %v2980_v19 = vadd.f32 %v4042_v39, %v5488_v44 }
 0x31e   : > { %3045 = vst [vmem:[%s5500_s17 + $0xd0] sm:$0xff] %v3013_v52  ;;  %v3014_v22 = vmax.f32 %v2982_v24, 0.0 }
 0x31f   : > { %3043 = vst [vmem:[%s5500_s17 + $0xc0] sm:$0xff] %v3011_v35  ;;  %v3012_v58 = vmax.f32 %v2980_v19, 0.0  ;;  %v3957_v17 = vpop.f32.mrb[28].mxu0 }
 0x320   : > { %3046 = vst [vmem:[%s5500_s17 + $0xd8] sm:$0xff] %v3014_v22  ;;  %v4045_v2 = vadd.f32 %v5479_v11, %v3957_v17  ;;  %v2901_v54 = vpop.f32.mrb[29].mxu0 }
 0x321   : > { %3044 = vst [vmem:[%s5500_s17 + $0xc8] sm:$0xff] %v3012_v58  ;;  %v4048_v53 = vadd.f32 %v5473_v38, %v2901_v54  ;;  %v3958_v50 = vpop.f32.mrb[30].mxu0 }
 0x322   : > { %v2985_v12 = vadd.f32 %v4045_v2, %v5488_v44  ;;  %v4051_v34 = vadd.f32 %v5482_v31, %v3958_v50  ;;  %v2904_v7 = vpop.f32.mrb[31].mxu0 }
 0x323   : > { %v2983_v56 = vadd.f32 %v4048_v53, %v5488_v44  ;;  %v4054_v32 = vadd.f32 %v5476_v3, %v2904_v7 }
 0x324   : > { %v3017_v11 = vmax.f32 %v2985_v12, 0.0  ;;  %v2986_v38 = vadd.f32 %v4051_v34, %v5488_v44 }
 0x325   : > { %v3015_v37 = vmax.f32 %v2983_v56, 0.0  ;;  %v2984_v59 = vadd.f32 %v4054_v32, %v5488_v44 }
 0x326   : > { %3049 = vst [vmem:[%s5500_s17 + $0xf0] sm:$0xff] %v3017_v11  ;;  %v3018_v62 = vmax.f32 %v2986_v38, 0.0 }
 0x327   : > { %3047 = vst [vmem:[%s5500_s17 + $0xe0] sm:$0xff] %v3015_v37  ;;  %v3016_v3 = vmax.f32 %v2984_v59, 0.0 }
 0x328   : > { %3050 = vst [vmem:[%s5500_s17 + $0xf8] sm:$0xff] %v3018_v62 }
 0x329   : > { %3048 = vst [vmem:[%s5500_s17 + $0xe8] sm:$0xff] %v3016_v3 }
 0x32a   : > { %4271 = shalt.err (!%p4268_p3)
}
 0x32b   : > { %s4272_s11 = scalar_lea.hbm %s5592_s6, 4096  ;;  %s4276_s14 = scalar_lea.hbm %s5647_s5, 8192 }
 0x32c   : > { %p4273_p4 = scmp.ne.s32.totalorder %s5592_s6, %s4272_s11  ;;  %p4277_p9 = scmp.lt.u32.totalorder %s5592_s6, %s5647_s5 }
 0x32d   : > { %p4278_p10 = scmp.lt.u32.totalorder %s4276_s14, %s4272_s11  ;;  %p4280_p12 = scmp.lt.u32.totalorder %s4272_s11, %s5592_s6 }
 0x32e   : > { %p4274_p7 = pnand %p4273_p4, %p4394_p5 }
 0x32f   : > { %p4279_p11 = por %p4278_p10, %p4277_p9 }
 0x330   : > { %p4275_p8 = pneg %p4274_p7 }
 0x331   : > { %p4281_p13 = por %p4280_p12, %p4279_p11 }
 0x333   : > { %p4282_p0 = pnand %p4281_p13, %p4275_p8 }
 0x335   : > { %4285 = shalt.err (!%p4282_p0)
}
 0x336   : > { %s4324_s17 = smov 128   ;;  %s4325_s23 = smov 8  }
 0x337   : > { %4119 = dma.vmem_to_hbm [thread:$0]  (%p4394_p5), %s5594_s25, 4096, %s5592_s6, %s5601_s22, %s4324_s17, %s4324_s17, %s4325_s23  }
 0x338 PF: > { %p4125_p1 = scmp.ge.s32.totalorder %s4320_s21, 2  ;;  %s3080_s26 = sand.u32 1, %s4308_s18  }
 0x339   : > { %s3081_s30 = scalar_lea.sflag [#allocation4], %s3080_s26 }
 0x33a   : > { %p4122_p2 = pnand %p4125_p1, %p4398_p6 }
 0x33c   : > { %4303 = dma.done.wait (!%p4122_p2), %s3081_s30, 4096  }
 0x33d   : > { %4305 = vsyncadd (!%p4122_p2), %s3081_s30, 4294963200  ;;  %p15_p3 = scmp.ge.s32.totalorder %s4381_s24, 4   ;;  %s5658_s18 = smov %s4312_s19 }
 0x33e   : > { %s5659_s19 = smov %s4316_s20  ;;  %s5660_s20 = smov %s4392_s27 }
 0x33f   : > { %s5661_s21 = smov %s4381_s24  ;;  %17 = sbr.rel (!%p15_p3) target bundleno = 3 (0x3), region = 80 }
 0x346   :  { %3086 = vsyncpa [#allocation4], 1 }
 0x347   :  { %3088 = vsyncpa [#allocation4 + $0x1], 1 }

</bundles_post_ra>
